<compile_context>
chip_gen: v7x
topology: tpu7x:2x2x1
jax: 0.10.0
libtpu: 0.0.40
codegen_flags: <defaults>
</compile_context>

<pallas_src>
import functools

import jax
import jax.numpy as jnp
from jax.experimental import pallas as pl
from jax.experimental.pallas import tpu as pltpu

NEG_BIG = -1e20  # matches torch masked_fill(mask == 0, float('-1e20'))

_PAR1 = pltpu.CompilerParams(dimension_semantics=("parallel",))


# ---------------------------------------------------------------------------
# In-kernel helpers
# ---------------------------------------------------------------------------

def _layernorm_f32(s, g, b):
    # LayerNorm eps=1e-5, biased variance (PyTorch nn.LayerNorm defaults).
    mu = jnp.mean(s, axis=-1, keepdims=True)
    var = jnp.mean((s - mu) ** 2, axis=-1, keepdims=True)
    return (s - mu) * jax.lax.rsqrt(var + 1e-5) * g + b


def _mha(q, k, v, bias, wo, bo, *, heads):
    """Multi-head attention core + single output projection.

    q: (Lq, E) f32 already scaled by 1/sqrt(E); k, v: (Lk, E) f32.
    bias: additive mask broadcastable to (H, Lq, Lk) (0 keep / -1e20 drop).
    wo: (E, E) bf16, bo: (1, E) f32.  Returns (Lq, E) f32.
    """
    lq, e = q.shape
    dh = e // heads
    qb = q.astype(jnp.bfloat16)
    kb = k.astype(jnp.bfloat16)
    vb = v.astype(jnp.bfloat16)
    # Heads as a leading batch dim -> one batched dot_general each for
    # scores and PV instead of H separate tiny matmul chains.
    qh = jnp.stack([qb[:, h * dh:(h + 1) * dh] for h in range(heads)], axis=0)
    kh = jnp.stack([kb[:, h * dh:(h + 1) * dh] for h in range(heads)], axis=0)
    vh = jnp.stack([vb[:, h * dh:(h + 1) * dh] for h in range(heads)], axis=0)
    s = jax.lax.dot_general(qh, kh, (((2,), (2,)), ((0,), (0,))),
                            preferred_element_type=jnp.float32)     # (H, Lq, Lk)
    s = s + bias                                                     # additive mask
    s = s - jnp.max(s, axis=-1, keepdims=True)
    p = jnp.exp(s)
    p = p * pl.reciprocal(jnp.sum(p, axis=-1, keepdims=True), approx=True)
    o = jax.lax.dot_general(p.astype(jnp.bfloat16), vh,
                            (((2,), (1,)), ((0,), (0,))),
                            preferred_element_type=jnp.float32)      # (H, Lq, Dh)
    # Merge heads -> (Lq, E), then ONE output projection (K = E contraction).
    ocat = jnp.concatenate([o[h] for h in range(heads)], axis=-1)
    return jnp.dot(ocat.astype(jnp.bfloat16), wo,
                   preferred_element_type=jnp.float32) + bo


# ---------------------------------------------------------------------------
# Fused per-layer kernels
# ---------------------------------------------------------------------------

def _encoder_layer_kernel(x_ref, pad_ref,
                          wqkv_ref, bqkv_ref, wo_ref, bo_ref, g1_ref, be1_ref,
                          w1_ref, b1_ref, w2_ref, b2_ref, g2_ref, be2_ref,
                          o_ref, *, heads, scale):
    # One batch: self-attn + add&LN + FFN + add&LN, all in VMEM.
    x = x_ref[0]                                            # (L, E) bf16
    e = x.shape[-1]
    qkv = jnp.dot(x, wqkv_ref[...],
                  preferred_element_type=jnp.float32) + bqkv_ref[...]   # (L, 3E)
    attn = _mha(qkv[:, :e] * scale, qkv[:, e:2 * e], qkv[:, 2 * e:],
                pad_ref[...], wo_ref[...], bo_ref[...], heads=heads)
    h = _layernorm_f32(x.astype(jnp.float32) + attn, g1_ref[...], be1_ref[...])
    f = jnp.dot(h.astype(jnp.bfloat16), w1_ref[...],
                preferred_element_type=jnp.float32) + b1_ref[...]
    f = jnp.maximum(f, 0.0)
    f = jnp.dot(f.astype(jnp.bfloat16), w2_ref[...],
                preferred_element_type=jnp.float32) + b2_ref[...]
    o_ref[0] = _layernorm_f32(h + f, g2_ref[...], be2_ref[...]).astype(o_ref.dtype)


def _decoder_layer_kernel(x_ref, enc_ref, pad_ref,
                          wqkv1_ref, bqkv1_ref, wo1_ref, bo1_ref, g1_ref, be1_ref,
                          wqkv2_ref, bqkv2_ref, wo2_ref, bo2_ref, g2_ref, be2_ref,
                          w1_ref, b1_ref, w2_ref, b2_ref, g3_ref, be3_ref,
                          o_ref, *, heads, scale):
    # One batch: causal self-attn + LN + cross-attn + LN + FFN + LN.
    x = x_ref[0]                                            # (Lt, E) bf16
    enc = enc_ref[0]                                        # (Ls, E) bf16
    lt, e = x.shape
    # Causal mask built in-kernel (no (N, Lt, Lt) HBM traffic).
    row = jax.lax.broadcasted_iota(jnp.int32, (lt, lt), 0)
    col = jax.lax.broadcasted_iota(jnp.int32, (lt, lt), 1)
    causal = jnp.where(col <= row, 0.0, NEG_BIG).astype(jnp.float32)[None]

    qkv = jnp.dot(x, wqkv1_ref[...],
                  preferred_element_type=jnp.float32) + bqkv1_ref[...]
    attn1 = _mha(qkv[:, :e] * scale, qkv[:, e:2 * e], qkv[:, 2 * e:],
                 causal, wo1_ref[...], bo1_ref[...], heads=heads)
    h1 = _layernorm_f32(x.astype(jnp.float32) + attn1, g1_ref[...], be1_ref[...])

    # Cross attention: queries from h1, keys/values from encoder output.
    w2qkv = wqkv2_ref[...]
    b2qkv = bqkv2_ref[...]
    q2 = (jnp.dot(h1.astype(jnp.bfloat16), w2qkv[:, :e],
                  preferred_element_type=jnp.float32) + b2qkv[:, :e]) * scale
    kv2 = jnp.dot(enc, w2qkv[:, e:],
                  preferred_element_type=jnp.float32) + b2qkv[:, e:]    # (Ls, 2E)
    attn2 = _mha(q2, kv2[:, :e], kv2[:, e:], pad_ref[...],
                 wo2_ref[...], bo2_ref[...], heads=heads)
    h2 = _layernorm_f32(h1 + attn2, g2_ref[...], be2_ref[...])

    f = jnp.dot(h2.astype(jnp.bfloat16), w1_ref[...],
                preferred_element_type=jnp.float32) + b1_ref[...]
    f = jnp.maximum(f, 0.0)
    f = jnp.dot(f.astype(jnp.bfloat16), w2_ref[...],
                preferred_element_type=jnp.float32) + b2_ref[...]
    o_ref[0] = _layernorm_f32(h2 + f, g3_ref[...], be3_ref[...]).astype(o_ref.dtype)


def _logits_kernel(x_ref, w_ref, b_ref, o_ref):
    # Whole (N*Lt, E) slab in one step; output lanes padded to 128-multiple.
    o_ref[...] = jnp.dot(x_ref[...], w_ref[...],
                         preferred_element_type=jnp.float32) + b_ref[...]


# ---------------------------------------------------------------------------
# Pallas-backed layer wrappers
# ---------------------------------------------------------------------------

def _full2(arr):
    # Whole-array 2-D block (weights / biases / LN params), constant index map.
    return pl.BlockSpec(arr.shape, lambda i: (0, 0))


def encoder_layer(p, x, pad_bias, heads):
    """x: (N, L, E) bf16, pad_bias: (N, 1, L) f32 additive pad mask."""
    n, l, e = x.shape
    a, f = p["attn"], p["ffn"]
    kern = functools.partial(_encoder_layer_kernel, heads=heads,
                             scale=1.0 / (e ** 0.5))
    return pl.pallas_call(
        kern,
        grid=(n,),
        in_specs=[
            pl.BlockSpec((1, l, e), lambda i: (i, 0, 0)),
            pl.BlockSpec((1, 1, l), lambda i: (i, 0, 0)),
            _full2(a["wqkv"]), _full2(a["bqkv"]), _full2(a["wo"]), _full2(a["bo"]),
            _full2(p["ln1_g"]), _full2(p["ln1_b"]),
            _full2(f["w1"]), _full2(f["b1"]), _full2(f["w2"]), _full2(f["b2"]),
            _full2(p["ln2_g"]), _full2(p["ln2_b"]),
        ],
        out_specs=pl.BlockSpec((1, l, e), lambda i: (i, 0, 0)),
        out_shape=jax.ShapeDtypeStruct((n, l, e), jnp.bfloat16),
        compiler_params=_PAR1,
    )(x, pad_bias,
      a["wqkv"], a["bqkv"], a["wo"], a["bo"], p["ln1_g"], p["ln1_b"],
      f["w1"], f["b1"], f["w2"], f["b2"], p["ln2_g"], p["ln2_b"])


def decoder_layer(p, x, enc_out, pad_bias, heads):
    """x: (N, Lt, E) bf16, enc_out: (N, Ls, E) bf16, pad_bias: (N, 1, Ls) f32."""
    n, lt, e = x.shape
    ls = enc_out.shape[1]
    a1, a2, f = p["attn1"], p["attn2"], p["ffn"]
    kern = functools.partial(_decoder_layer_kernel, heads=heads,
                             scale=1.0 / (e ** 0.5))
    return pl.pallas_call(
        kern,
        grid=(n,),
        in_specs=[
            pl.BlockSpec((1, lt, e), lambda i: (i, 0, 0)),
            pl.BlockSpec((1, ls, e), lambda i: (i, 0, 0)),
            pl.BlockSpec((1, 1, ls), lambda i: (i, 0, 0)),
            _full2(a1["wqkv"]), _full2(a1["bqkv"]), _full2(a1["wo"]), _full2(a1["bo"]),
            _full2(p["ln1_g"]), _full2(p["ln1_b"]),
            _full2(a2["wqkv"]), _full2(a2["bqkv"]), _full2(a2["wo"]), _full2(a2["bo"]),
            _full2(p["ln2_g"]), _full2(p["ln2_b"]),
            _full2(f["w1"]), _full2(f["b1"]), _full2(f["w2"]), _full2(f["b2"]),
            _full2(p["ln3_g"]), _full2(p["ln3_b"]),
        ],
        out_specs=pl.BlockSpec((1, lt, e), lambda i: (i, 0, 0)),
        out_shape=jax.ShapeDtypeStruct((n, lt, e), jnp.bfloat16),
        compiler_params=_PAR1,
    )(x, enc_out, pad_bias,
      a1["wqkv"], a1["bqkv"], a1["wo"], a1["bo"], p["ln1_g"], p["ln1_b"],
      a2["wqkv"], a2["bqkv"], a2["wo"], a2["bo"], p["ln2_g"], p["ln2_b"],
      f["w1"], f["b1"], f["w2"], f["b2"], p["ln3_g"], p["ln3_b"])


def vocab_logits(x2d, w_pad, b_pad):
    """x2d: (M, E) bf16, w_pad: (E, Vp) bf16 (Vp multiple of 128), b_pad: (1, Vp)."""
    m, e = x2d.shape
    vp = w_pad.shape[1]
    return pl.pallas_call(
        _logits_kernel,
        grid=(1,),
        in_specs=[
            pl.BlockSpec((m, e), lambda i: (0, 0)),
            pl.BlockSpec((e, vp), lambda i: (0, 0)),
            pl.BlockSpec((1, vp), lambda i: (0, 0)),
        ],
        out_specs=pl.BlockSpec((m, vp), lambda i: (0, 0)),
        out_shape=jax.ShapeDtypeStruct((m, vp), jnp.float32),
        compiler_params=pltpu.CompilerParams(dimension_semantics=("arbitrary",)),
    )(x2d, w_pad, b_pad)


# ---------------------------------------------------------------------------
# Forward pass
# ---------------------------------------------------------------------------

def transformer_forward(params, src, trg, *, src_pad_idx, heads, trg_vocab):
    n, ls = src.shape
    _, lt = trg.shape

    # Only the (N, 1, Ls) additive pad-bias row is DMA'd into the kernels.
    src_pad_bias = jnp.where(src != src_pad_idx, 0.0, NEG_BIG)
    src_pad_bias = src_pad_bias.astype(jnp.float32).reshape(n, 1, ls)

    enc = params["enc"]
    enc_x = (enc["tok_emb"][src] + enc["pos_emb"][:ls][None]).astype(jnp.bfloat16)
    for lp in enc["layers"]:
        enc_x = encoder_layer(lp, enc_x, src_pad_bias, heads)

    dec = params["dec"]
    dec_x = (dec["tok_emb"][trg] + dec["pos_emb"][:lt][None]).astype(jnp.bfloat16)
    for lp in dec["layers"]:
        dec_x = decoder_layer(lp, dec_x, enc_x, src_pad_bias, heads)

    e = dec_x.shape[-1]
    logits_pad = vocab_logits(dec_x.reshape(n * lt, e),
                              dec["wout_pad"], dec["bout_pad"])
    return logits_pad[:, :trg_vocab].reshape(n, lt, trg_vocab)


# ---------------------------------------------------------------------------
# Deterministic parameter initialization
# ---------------------------------------------------------------------------

def _init_linear(key, din, dout):
    kw, kb = jax.random.split(key)
    w = 0.05 * jax.random.normal(kw, (din, dout), jnp.float32)
    b = 0.05 * jax.random.normal(kb, (1, dout), jnp.float32)
    return w, b


def _init_attention(key, e):
    ks = jax.random.split(key, 4)
    wq, bq = _init_linear(ks[0], e, e)
    wk, bk = _init_linear(ks[1], e, e)
    wv, bv = _init_linear(ks[2], e, e)
    wo, bo = _init_linear(ks[3], e, e)
    return {"wqkv": jnp.concatenate([wq, wk, wv], axis=1).astype(jnp.bfloat16),
            "bqkv": jnp.concatenate([bq, bk, bv], axis=1),
            "wo": wo.astype(jnp.bfloat16), "bo": bo}


def _init_ffn(key, e, expansion):
    k1, k2 = jax.random.split(key)
    w1, b1 = _init_linear(k1, e, expansion * e)
    w2, b2 = _init_linear(k2, expansion * e, e)
    return {"w1": w1.astype(jnp.bfloat16), "b1": b1,
            "w2": w2.astype(jnp.bfloat16), "b2": b2}


def _ln_pair(e):
    return jnp.ones((1, e), jnp.float32), jnp.zeros((1, e), jnp.float32)


def _init_enc_block(key, e, expansion):
    k1, k2 = jax.random.split(key)
    g1, b1 = _ln_pair(e)
    g2, b2 = _ln_pair(e)
    return {"attn": _init_attention(k1, e), "ffn": _init_ffn(k2, e, expansion),
            "ln1_g": g1, "ln1_b": b1, "ln2_g": g2, "ln2_b": b2}


def _init_dec_block(key, e, expansion):
    k1, k2, k3 = jax.random.split(key, 3)
    g1, b1 = _ln_pair(e)
    g2, b2 = _ln_pair(e)
    g3, b3 = _ln_pair(e)
    return {"attn1": _init_attention(k1, e), "attn2": _init_attention(k2, e),
            "ffn": _init_ffn(k3, e, expansion),
            "ln1_g": g1, "ln1_b": b1, "ln2_g": g2, "ln2_b": b2,
            "ln3_g": g3, "ln3_b": b3}


def init_transformer(key, *, src_vocab, trg_vocab, max_length, e, num_layers,
                     expansion):
    assert e % 8 == 0
    keys = jax.random.split(key, 7)
    enc = {
        "tok_emb": 0.05 * jax.random.normal(keys[0], (src_vocab, e), jnp.float32),
        "pos_emb": 0.05 * jax.random.normal(keys[1], (max_length, e), jnp.float32),
        "layers": [_init_enc_block(k, e, expansion)
                   for k in jax.random.split(keys[2], num_layers)],
    }
    wout, bout = _init_linear(keys[5], e, trg_vocab)
    vpad = ((trg_vocab + 127) // 128) * 128          # lane-dense (128-mult) logits
    wout_pad = jnp.zeros((e, vpad), jnp.float32).at[:, :trg_vocab].set(wout)
    bout_pad = jnp.zeros((1, vpad), jnp.float32).at[:, :trg_vocab].set(bout)
    dec = {
        "tok_emb": 0.05 * jax.random.normal(keys[3], (trg_vocab, e), jnp.float32),
        "pos_emb": 0.05 * jax.random.normal(keys[4], (max_length, e), jnp.float32),
        "layers": [_init_dec_block(k, e, expansion)
                   for k in jax.random.split(keys[6], num_layers)],
        "wout_pad": wout_pad.astype(jnp.bfloat16), "bout_pad": bout_pad,
    }
    return {"enc": enc, "dec": dec}


# ---------------------------------------------------------------------------
# Main
# ---------------------------------------------------------------------------

if __name__ == "__main__":
    SRC_VOCAB = 50
    TRG_VOCAB = 48
    MAX_LEN = 16
    EMBED = 32
    LAYERS = 2
    HEADS = 4
    EXPANSION = 2
    SRC_PAD_IDX = 0
    BATCH, SRC_LEN, TRG_LEN = 2, 8, 8
    assert EMBED % HEADS == 0

    root = jax.random.PRNGKey(0)
    k_params, k_src, k_trg = jax.random.split(root, 3)

    params = init_transformer(k_params, src_vocab=SRC_VOCAB, trg_vocab=TRG_VOCAB,
                              max_length=MAX_LEN, e=EMBED, num_layers=LAYERS,
                              expansion=EXPANSION)

    src = jax.random.randint(k_src, (BATCH, SRC_LEN), 0, SRC_VOCAB, dtype=jnp.int32)
    trg = jax.random.randint(k_trg, (BATCH, TRG_LEN), 0, TRG_VOCAB, dtype=jnp.int32)

    fwd = jax.jit(functools.partial(transformer_forward, src_pad_idx=SRC_PAD_IDX,
                                    heads=HEADS, trg_vocab=TRG_VOCAB))
    out = fwd(params, src, trg)
    jax.block_until_ready(out)

    assert out.shape == (BATCH, TRG_LEN, TRG_VOCAB), out.shape
    assert bool(jnp.all(jnp.isfinite(out)))
    print("KERNEL_OK")
</pallas_src>

<mosaic_0001>
module attributes {stable_mosaic.version = 11 : i64} {
  func.func @_logits_kernel(%arg0: i32, %arg1: memref<16x32xbf16, #tpu.memory_space<vmem>>, %arg2: memref<32x128xbf16, #tpu.memory_space<vmem>>, %arg3: memref<1x128xf32, #tpu.memory_space<vmem>>, %arg4: memref<16x128xf32, #tpu.memory_space<vmem>>) attributes {dimension_semantics = [#tpu.dimension_semantics<arbitrary>], iteration_bounds = array<i64: 1>, scalar_prefetch = 0 : i64, scratch_operands = 0 : i64, tpu.core_type = #tpu.core_type<tc>, window_params = [{pipeline_mode = #tpu.pipeline_mode<synchronous>, transform_indices = @transform_0, window_bounds = array<i64: 16, 32>}, {pipeline_mode = #tpu.pipeline_mode<synchronous>, transform_indices = @transform_1, window_bounds = array<i64: 32, 128>}, {pipeline_mode = #tpu.pipeline_mode<synchronous>, transform_indices = @transform_2, window_bounds = array<i64: 1, 128>}, {pipeline_mode = #tpu.pipeline_mode<synchronous>, transform_indices = @transform_3, window_bounds = array<i64: 16, 128>}]} {
    %c0 = arith.constant 0 : index
    %c0_0 = arith.constant 0 : index
    %0 = vector.load %arg1[%c0, %c0_0] : memref<16x32xbf16, #tpu.memory_space<vmem>>, vector<16x32xbf16>
    %c0_1 = arith.constant 0 : index
    %c0_2 = arith.constant 0 : index
    %1 = vector.load %arg2[%c0_1, %c0_2] : memref<32x128xbf16, #tpu.memory_space<vmem>>, vector<32x128xbf16>
    %cst = arith.constant dense<0.000000e+00> : vector<16x128xf32>
    %2 = tpu.matmul %0, %1, %cst {dimension_numbers = #tpu.dot_dimension_numbers<[1], [0], [0], [1], [0, 0, 1, 1], [], []>} : vector<16x32xbf16>, vector<32x128xbf16>, vector<16x128xf32> -> vector<16x128xf32>
    %c0_3 = arith.constant 0 : index
    %c0_4 = arith.constant 0 : index
    %3 = vector.load %arg3[%c0_3, %c0_4] : memref<1x128xf32, #tpu.memory_space<vmem>>, vector<1x128xf32>
    %4 = vector.broadcast %3 : vector<1x128xf32> to vector<16x128xf32>
    %5 = arith.addf %2, %4 : vector<16x128xf32>
    %c0_5 = arith.constant 0 : index
    %c0_6 = arith.constant 0 : index
    %6 = vector.load %arg4[%c0_5, %c0_6] : memref<16x128xf32, #tpu.memory_space<vmem>>, vector<16x128xf32>
    tpu.vector_store %arg4[%c0_5, %c0_6], %5 {strides = array<i32>} : memref<16x128xf32, #tpu.memory_space<vmem>>, vector<16x128xf32>,
    return
  }
  func.func @transform_0(%arg0: i32) -> (i32, i32) {
    %c0_i32 = arith.constant 0 : i32
    %c0_i32_0 = arith.constant 0 : i32
    %c0_i32_1 = arith.constant 0 : i32
    return %c0_i32, %c0_i32_0 : i32, i32
  }
  func.func @transform_1(%arg0: i32) -> (i32, i32) {
    %c0_i32 = arith.constant 0 : i32
    %c0_i32_0 = arith.constant 0 : i32
    %c0_i32_1 = arith.constant 0 : i32
    return %c0_i32, %c0_i32_0 : i32, i32
  }
  func.func @transform_2(%arg0: i32) -> (i32, i32) {
    %c0_i32 = arith.constant 0 : i32
    %c0_i32_0 = arith.constant 0 : i32
    %c0_i32_1 = arith.constant 0 : i32
    return %c0_i32, %c0_i32_0 : i32, i32
  }
  func.func @transform_3(%arg0: i32) -> (i32, i32) {
    %c0_i32 = arith.constant 0 : i32
    %c0_i32_0 = arith.constant 0 : i32
    %c0_i32_1 = arith.constant 0 : i32
    return %c0_i32, %c0_i32_0 : i32, i32
  }
}

module attributes {stable_mosaic.version = 11 : i64} {
  func.func @_encoder_layer_kernel(%arg0: i32, %arg1: memref<1x8x32xbf16, #tpu.memory_space<vmem>>, %arg2: memref<1x1x8xf32, #tpu.memory_space<vmem>>, %arg3: memref<32x96xbf16, #tpu.memory_space<vmem>>, %arg4: memref<1x96xf32, #tpu.memory_space<vmem>>, %arg5: memref<32x32xbf16, #tpu.memory_space<vmem>>, %arg6: memref<1x32xf32, #tpu.memory_space<vmem>>, %arg7: memref<1x32xf32, #tpu.memory_space<vmem>>, %arg8: memref<1x32xf32, #tpu.memory_space<vmem>>, %arg9: memref<32x64xbf16, #tpu.memory_space<vmem>>, %arg10: memref<1x64xf32, #tpu.memory_space<vmem>>, %arg11: memref<64x32xbf16, #tpu.memory_space<vmem>>, %arg12: memref<1x32xf32, #tpu.memory_space<vmem>>, %arg13: memref<1x32xf32, #tpu.memory_space<vmem>>, %arg14: memref<1x32xf32, #tpu.memory_space<vmem>>, %arg15: memref<1x8x32xbf16, #tpu.memory_space<vmem>>) attributes {dimension_semantics = [#tpu.dimension_semantics<parallel>], iteration_bounds = array<i64: 2>, scalar_prefetch = 0 : i64, scratch_operands = 0 : i64, tpu.core_type = #tpu.core_type<tc>, window_params = [{transform_indices = @transform_0, window_bounds = array<i64: 1, 8, 32>}, {transform_indices = @transform_1, window_bounds = array<i64: 1, 1, 8>}, {pipeline_mode = #tpu.pipeline_mode<synchronous>, transform_indices = @transform_2, window_bounds = array<i64: 32, 96>}, {pipeline_mode = #tpu.pipeline_mode<synchronous>, transform_indices = @transform_3, window_bounds = array<i64: 1, 96>}, {pipeline_mode = #tpu.pipeline_mode<synchronous>, transform_indices = @transform_4, window_bounds = array<i64: 32, 32>}, {pipeline_mode = #tpu.pipeline_mode<synchronous>, transform_indices = @transform_5, window_bounds = array<i64: 1, 32>}, {pipeline_mode = #tpu.pipeline_mode<synchronous>, transform_indices = @transform_6, window_bounds = array<i64: 1, 32>}, {pipeline_mode = #tpu.pipeline_mode<synchronous>, transform_indices = @transform_7, window_bounds = array<i64: 1, 32>}, {pipeline_mode = #tpu.pipeline_mode<synchronous>, transform_indices = @transform_8, window_bounds = array<i64: 32, 64>}, {pipeline_mode = #tpu.pipeline_mode<synchronous>, transform_indices = @transform_9, window_bounds = array<i64: 1, 64>}, {pipeline_mode = #tpu.pipeline_mode<synchronous>, transform_indices = @transform_10, window_bounds = array<i64: 64, 32>}, {pipeline_mode = #tpu.pipeline_mode<synchronous>, transform_indices = @transform_11, window_bounds = array<i64: 1, 32>}, {pipeline_mode = #tpu.pipeline_mode<synchronous>, transform_indices = @transform_12, window_bounds = array<i64: 1, 32>}, {pipeline_mode = #tpu.pipeline_mode<synchronous>, transform_indices = @transform_13, window_bounds = array<i64: 1, 32>}, {transform_indices = @transform_14, window_bounds = array<i64: 1, 8, 32>}]} {
    %c0 = arith.constant 0 : index
    %c0_0 = arith.constant 0 : index
    %c0_1 = arith.constant 0 : index
    %0 = vector.load %arg1[%c0, %c0_0, %c0_1] : memref<1x8x32xbf16, #tpu.memory_space<vmem>>, vector<1x8x32xbf16>
    %1 = vector.shape_cast %0 : vector<1x8x32xbf16> to vector<8x32xbf16>
    %c0_2 = arith.constant 0 : index
    %c0_3 = arith.constant 0 : index
    %2 = vector.load %arg3[%c0_2, %c0_3] : memref<32x96xbf16, #tpu.memory_space<vmem>>, vector<32x96xbf16>
    %cst = arith.constant dense<0.000000e+00> : vector<8x96xf32>
    %3 = tpu.matmul %1, %2, %cst {dimension_numbers = #tpu.dot_dimension_numbers<[1], [0], [0], [1], [0, 0, 1, 1], [], []>} : vector<8x32xbf16>, vector<32x96xbf16>, vector<8x96xf32> -> vector<8x96xf32>
    %c0_4 = arith.constant 0 : index
    %c0_5 = arith.constant 0 : index
    %4 = vector.load %arg4[%c0_4, %c0_5] : memref<1x96xf32, #tpu.memory_space<vmem>>, vector<1x96xf32>
    %5 = vector.broadcast %4 : vector<1x96xf32> to vector<8x96xf32>
    %6 = arith.addf %3, %5 : vector<8x96xf32>
    %7 = vector.extract_strided_slice %6 {offsets = [0, 0], sizes = [8, 32], strides = [1, 1]} : vector<8x96xf32> to vector<8x32xf32>
    %cst_6 = arith.constant 0.176776692 : f32
    %8 = vector.broadcast %cst_6 : f32 to vector<8x32xf32>
    %9 = arith.mulf %7, %8 : vector<8x32xf32>
    %10 = vector.extract_strided_slice %6 {offsets = [0, 32], sizes = [8, 32], strides = [1, 1]} : vector<8x96xf32> to vector<8x32xf32>
    %11 = vector.extract_strided_slice %6 {offsets = [0, 64], sizes = [8, 32], strides = [1, 1]} : vector<8x96xf32> to vector<8x32xf32>
    %c0_7 = arith.constant 0 : index
    %c0_8 = arith.constant 0 : index
    %c0_9 = arith.constant 0 : index
    %12 = vector.load %arg2[%c0_7, %c0_8, %c0_9] : memref<1x1x8xf32, #tpu.memory_space<vmem>>, vector<1x1x8xf32>
    %c0_10 = arith.constant 0 : index
    %c0_11 = arith.constant 0 : index
    %13 = vector.load %arg5[%c0_10, %c0_11] : memref<32x32xbf16, #tpu.memory_space<vmem>>, vector<32x32xbf16>
    %c0_12 = arith.constant 0 : index
    %c0_13 = arith.constant 0 : index
    %14 = vector.load %arg6[%c0_12, %c0_13] : memref<1x32xf32, #tpu.memory_space<vmem>>, vector<1x32xf32>
    %15 = arith.truncf %9 : vector<8x32xf32> to vector<8x32xbf16>
    %16 = arith.truncf %10 : vector<8x32xf32> to vector<8x32xbf16>
    %17 = arith.truncf %11 : vector<8x32xf32> to vector<8x32xbf16>
    %18 = vector.extract_strided_slice %15 {offsets = [0, 0], sizes = [8, 8], strides = [1, 1]} : vector<8x32xbf16> to vector<8x8xbf16>
    %19 = vector.extract_strided_slice %15 {offsets = [0, 8], sizes = [8, 8], strides = [1, 1]} : vector<8x32xbf16> to vector<8x8xbf16>
    %20 = vector.extract_strided_slice %15 {offsets = [0, 16], sizes = [8, 8], strides = [1, 1]} : vector<8x32xbf16> to vector<8x8xbf16>
    %21 = vector.extract_strided_slice %15 {offsets = [0, 24], sizes = [8, 8], strides = [1, 1]} : vector<8x32xbf16> to vector<8x8xbf16>
    %22 = vector.shape_cast %18 : vector<8x8xbf16> to vector<1x8x8xbf16>
    %23 = vector.shape_cast %19 : vector<8x8xbf16> to vector<1x8x8xbf16>
    %24 = vector.shape_cast %20 : vector<8x8xbf16> to vector<1x8x8xbf16>
    %25 = vector.shape_cast %21 : vector<8x8xbf16> to vector<1x8x8xbf16>
    %26 = tpu.concatenate %22, %23, %24, %25 in 0 : vector<1x8x8xbf16>, vector<1x8x8xbf16>, vector<1x8x8xbf16>, vector<1x8x8xbf16> -> vector<4x8x8xbf16>
    %27 = vector.extract_strided_slice %16 {offsets = [0, 0], sizes = [8, 8], strides = [1, 1]} : vector<8x32xbf16> to vector<8x8xbf16>
    %28 = vector.extract_strided_slice %16 {offsets = [0, 8], sizes = [8, 8], strides = [1, 1]} : vector<8x32xbf16> to vector<8x8xbf16>
    %29 = vector.extract_strided_slice %16 {offsets = [0, 16], sizes = [8, 8], strides = [1, 1]} : vector<8x32xbf16> to vector<8x8xbf16>
    %30 = vector.extract_strided_slice %16 {offsets = [0, 24], sizes = [8, 8], strides = [1, 1]} : vector<8x32xbf16> to vector<8x8xbf16>
    %31 = vector.shape_cast %27 : vector<8x8xbf16> to vector<1x8x8xbf16>
    %32 = vector.shape_cast %28 : vector<8x8xbf16> to vector<1x8x8xbf16>
    %33 = vector.shape_cast %29 : vector<8x8xbf16> to vector<1x8x8xbf16>
    %34 = vector.shape_cast %30 : vector<8x8xbf16> to vector<1x8x8xbf16>
    %35 = tpu.concatenate %31, %32, %33, %34 in 0 : vector<1x8x8xbf16>, vector<1x8x8xbf16>, vector<1x8x8xbf16>, vector<1x8x8xbf16> -> vector<4x8x8xbf16>
    %36 = vector.extract_strided_slice %17 {offsets = [0, 0], sizes = [8, 8], strides = [1, 1]} : vector<8x32xbf16> to vector<8x8xbf16>
    %37 = vector.extract_strided_slice %17 {offsets = [0, 8], sizes = [8, 8], strides = [1, 1]} : vector<8x32xbf16> to vector<8x8xbf16>
    %38 = vector.extract_strided_slice %17 {offsets = [0, 16], sizes = [8, 8], strides = [1, 1]} : vector<8x32xbf16> to vector<8x8xbf16>
    %39 = vector.extract_strided_slice %17 {offsets = [0, 24], sizes = [8, 8], strides = [1, 1]} : vector<8x32xbf16> to vector<8x8xbf16>
    %40 = vector.shape_cast %36 : vector<8x8xbf16> to vector<1x8x8xbf16>
    %41 = vector.shape_cast %37 : vector<8x8xbf16> to vector<1x8x8xbf16>
    %42 = vector.shape_cast %38 : vector<8x8xbf16> to vector<1x8x8xbf16>
    %43 = vector.shape_cast %39 : vector<8x8xbf16> to vector<1x8x8xbf16>
    %44 = tpu.concatenate %40, %41, %42, %43 in 0 : vector<1x8x8xbf16>, vector<1x8x8xbf16>, vector<1x8x8xbf16>, vector<1x8x8xbf16> -> vector<4x8x8xbf16>
    %cst_14 = arith.constant dense<0.000000e+00> : vector<4x8x8xf32>
    %45 = tpu.matmul %26, %35, %cst_14 {dimension_numbers = #tpu.dot_dimension_numbers<[2], [2], [1], [1], [0, 0, 0, 1, 1, 1], [0], [0]>} : vector<4x8x8xbf16>, vector<4x8x8xbf16>, vector<4x8x8xf32> -> vector<4x8x8xf32>
    %46 = vector.broadcast %12 : vector<1x1x8xf32> to vector<4x8x8xf32>
    %47 = arith.addf %45, %46 : vector<4x8x8xf32>
    %cst_15 = arith.constant dense<0xFF800000> : vector<4x8xf32>
    %48 = vector.multi_reduction <maximumf>, %47, %cst_15 [2] : vector<4x8x8xf32> to vector<4x8xf32>
    %49 = vector.shape_cast %48 : vector<4x8xf32> to vector<4x8x1xf32>
    %50 = vector.broadcast %49 : vector<4x8x1xf32> to vector<4x8x8xf32>
    %51 = arith.subf %47, %50 : vector<4x8x8xf32>
    %52 = math.exp %51 : vector<4x8x8xf32>
    %cst_16 = arith.constant dense<0.000000e+00> : vector<4x8xf32>
    %53 = vector.multi_reduction <add>, %52, %cst_16 [2] : vector<4x8x8xf32> to vector<4x8xf32>
    %54 = vector.shape_cast %53 : vector<4x8xf32> to vector<4x8x1xf32>
    %55 = tpu.reciprocal %54 {approx = true} : vector<4x8x1xf32> -> vector<4x8x1xf32>
    %56 = vector.broadcast %55 : vector<4x8x1xf32> to vector<4x8x8xf32>
    %57 = arith.mulf %52, %56 : vector<4x8x8xf32>
    %58 = arith.truncf %57 : vector<4x8x8xf32> to vector<4x8x8xbf16>
    %cst_17 = arith.constant dense<0.000000e+00> : vector<4x8x8xf32>
    %59 = tpu.matmul %58, %44, %cst_17 {dimension_numbers = #tpu.dot_dimension_numbers<[2], [1], [1], [2], [0, 0, 0, 1, 1, 2], [0], [0]>} : vector<4x8x8xbf16>, vector<4x8x8xbf16>, vector<4x8x8xf32> -> vector<4x8x8xf32>
    %60 = vector.extract_strided_slice %59 {offsets = [0, 0, 0], sizes = [1, 8, 8], strides = [1, 1, 1]} : vector<4x8x8xf32> to vector<1x8x8xf32>
    %61 = vector.shape_cast %60 : vector<1x8x8xf32> to vector<8x8xf32>
    %62 = vector.extract_strided_slice %59 {offsets = [1, 0, 0], sizes = [1, 8, 8], strides = [1, 1, 1]} : vector<4x8x8xf32> to vector<1x8x8xf32>
    %63 = vector.shape_cast %62 : vector<1x8x8xf32> to vector<8x8xf32>
    %64 = vector.extract_strided_slice %59 {offsets = [2, 0, 0], sizes = [1, 8, 8], strides = [1, 1, 1]} : vector<4x8x8xf32> to vector<1x8x8xf32>
    %65 = vector.shape_cast %64 : vector<1x8x8xf32> to vector<8x8xf32>
    %66 = vector.extract_strided_slice %59 {offsets = [3, 0, 0], sizes = [1, 8, 8], strides = [1, 1, 1]} : vector<4x8x8xf32> to vector<1x8x8xf32>
    %67 = vector.shape_cast %66 : vector<1x8x8xf32> to vector<8x8xf32>
    %68 = tpu.concatenate %61, %63, %65, %67 in 1 : vector<8x8xf32>, vector<8x8xf32>, vector<8x8xf32>, vector<8x8xf32> -> vector<8x32xf32>
    %69 = arith.truncf %68 : vector<8x32xf32> to vector<8x32xbf16>
    %cst_18 = arith.constant dense<0.000000e+00> : vector<8x32xf32>
    %70 = tpu.matmul %69, %13, %cst_18 {dimension_numbers = #tpu.dot_dimension_numbers<[1], [0], [0], [1], [0, 0, 1, 1], [], []>} : vector<8x32xbf16>, vector<32x32xbf16>, vector<8x32xf32> -> vector<8x32xf32>
    %71 = vector.broadcast %14 : vector<1x32xf32> to vector<8x32xf32>
    %72 = arith.addf %70, %71 : vector<8x32xf32>
    %73 = arith.extf %1 : vector<8x32xbf16> to vector<8x32xf32>
    %74 = arith.addf %73, %72 : vector<8x32xf32>
    %c0_19 = arith.constant 0 : index
    %c0_20 = arith.constant 0 : index
    %75 = vector.load %arg7[%c0_19, %c0_20] : memref<1x32xf32, #tpu.memory_space<vmem>>, vector<1x32xf32>
    %c0_21 = arith.constant 0 : index
    %c0_22 = arith.constant 0 : index
    %76 = vector.load %arg8[%c0_21, %c0_22] : memref<1x32xf32, #tpu.memory_space<vmem>>, vector<1x32xf32>
    %cst_23 = arith.constant dense<0.000000e+00> : vector<8xf32>
    %77 = vector.multi_reduction <add>, %74, %cst_23 [1] : vector<8x32xf32> to vector<8xf32>
    %78 = vector.shape_cast %77 : vector<8xf32> to vector<8x1xf32>
    %cst_24 = arith.constant 3.200000e+01 : f32
    %79 = vector.broadcast %cst_24 : f32 to vector<8x1xf32>
    %80 = arith.divf %78, %79 : vector<8x1xf32>
    %81 = vector.broadcast %80 : vector<8x1xf32> to vector<8x32xf32>
    %82 = arith.subf %74, %81 : vector<8x32xf32>
    %83 = arith.mulf %82, %82 : vector<8x32xf32>
    %cst_25 = arith.constant dense<0.000000e+00> : vector<8xf32>
    %84 = vector.multi_reduction <add>, %83, %cst_25 [1] : vector<8x32xf32> to vector<8xf32>
    %85 = vector.shape_cast %84 : vector<8xf32> to vector<8x1xf32>
    %cst_26 = arith.constant 3.200000e+01 : f32
    %86 = vector.broadcast %cst_26 : f32 to vector<8x1xf32>
    %87 = arith.divf %85, %86 : vector<8x1xf32>
    %88 = vector.broadcast %80 : vector<8x1xf32> to vector<8x32xf32>
    %89 = arith.subf %74, %88 : vector<8x32xf32>
    %cst_27 = arith.constant 9.99999974E-6 : f32
    %90 = vector.broadcast %cst_27 : f32 to vector<8x1xf32>
    %91 = arith.addf %87, %90 : vector<8x1xf32>
    %92 = math.rsqrt %91 : vector<8x1xf32>
    %93 = vector.broadcast %92 : vector<8x1xf32> to vector<8x32xf32>
    %94 = arith.mulf %89, %93 : vector<8x32xf32>
    %95 = vector.broadcast %75 : vector<1x32xf32> to vector<8x32xf32>
    %96 = arith.mulf %94, %95 : vector<8x32xf32>
    %97 = vector.broadcast %76 : vector<1x32xf32> to vector<8x32xf32>
    %98 = arith.addf %96, %97 : vector<8x32xf32>
    %99 = arith.truncf %98 : vector<8x32xf32> to vector<8x32xbf16>
    %c0_28 = arith.constant 0 : index
    %c0_29 = arith.constant 0 : index
    %100 = vector.load %arg9[%c0_28, %c0_29] : memref<32x64xbf16, #tpu.memory_space<vmem>>, vector<32x64xbf16>
    %cst_30 = arith.constant dense<0.000000e+00> : vector<8x64xf32>
    %101 = tpu.matmul %99, %100, %cst_30 {dimension_numbers = #tpu.dot_dimension_numbers<[1], [0], [0], [1], [0, 0, 1, 1], [], []>} : vector<8x32xbf16>, vector<32x64xbf16>, vector<8x64xf32> -> vector<8x64xf32>
    %c0_31 = arith.constant 0 : index
    %c0_32 = arith.constant 0 : index
    %102 = vector.load %arg10[%c0_31, %c0_32] : memref<1x64xf32, #tpu.memory_space<vmem>>, vector<1x64xf32>
    %103 = vector.broadcast %102 : vector<1x64xf32> to vector<8x64xf32>
    %104 = arith.addf %101, %103 : vector<8x64xf32>
    %cst_33 = arith.constant 0.000000e+00 : f32
    %105 = vector.broadcast %cst_33 : f32 to vector<8x64xf32>
    %106 = arith.maximumf %104, %105 : vector<8x64xf32>
    %107 = arith.truncf %106 : vector<8x64xf32> to vector<8x64xbf16>
    %c0_34 = arith.constant 0 : index
    %c0_35 = arith.constant 0 : index
    %108 = vector.load %arg11[%c0_34, %c0_35] : memref<64x32xbf16, #tpu.memory_space<vmem>>, vector<64x32xbf16>
    %cst_36 = arith.constant dense<0.000000e+00> : vector<8x32xf32>
    %109 = tpu.matmul %107, %108, %cst_36 {dimension_numbers = #tpu.dot_dimension_numbers<[1], [0], [0], [1], [0, 0, 1, 1], [], []>} : vector<8x64xbf16>, vector<64x32xbf16>, vector<8x32xf32> -> vector<8x32xf32>
    %c0_37 = arith.constant 0 : index
    %c0_38 = arith.constant 0 : index
    %110 = vector.load %arg12[%c0_37, %c0_38] : memref<1x32xf32, #tpu.memory_space<vmem>>, vector<1x32xf32>
    %111 = vector.broadcast %110 : vector<1x32xf32> to vector<8x32xf32>
    %112 = arith.addf %109, %111 : vector<8x32xf32>
    %113 = arith.addf %98, %112 : vector<8x32xf32>
    %c0_39 = arith.constant 0 : index
    %c0_40 = arith.constant 0 : index
    %114 = vector.load %arg13[%c0_39, %c0_40] : memref<1x32xf32, #tpu.memory_space<vmem>>, vector<1x32xf32>
    %c0_41 = arith.constant 0 : index
    %c0_42 = arith.constant 0 : index
    %115 = vector.load %arg14[%c0_41, %c0_42] : memref<1x32xf32, #tpu.memory_space<vmem>>, vector<1x32xf32>
    %cst_43 = arith.constant dense<0.000000e+00> : vector<8xf32>
    %116 = vector.multi_reduction <add>, %113, %cst_43 [1] : vector<8x32xf32> to vector<8xf32>
    %117 = vector.shape_cast %116 : vector<8xf32> to vector<8x1xf32>
    %cst_44 = arith.constant 3.200000e+01 : f32
    %118 = vector.broadcast %cst_44 : f32 to vector<8x1xf32>
    %119 = arith.divf %117, %118 : vector<8x1xf32>
    %120 = vector.broadcast %119 : vector<8x1xf32> to vector<8x32xf32>
    %121 = arith.subf %113, %120 : vector<8x32xf32>
    %122 = arith.mulf %121, %121 : vector<8x32xf32>
    %cst_45 = arith.constant dense<0.000000e+00> : vector<8xf32>
    %123 = vector.multi_reduction <add>, %122, %cst_45 [1] : vector<8x32xf32> to vector<8xf32>
    %124 = vector.shape_cast %123 : vector<8xf32> to vector<8x1xf32>
    %cst_46 = arith.constant 3.200000e+01 : f32
    %125 = vector.broadcast %cst_46 : f32 to vector<8x1xf32>
    %126 = arith.divf %124, %125 : vector<8x1xf32>
    %127 = vector.broadcast %119 : vector<8x1xf32> to vector<8x32xf32>
    %128 = arith.subf %113, %127 : vector<8x32xf32>
    %cst_47 = arith.constant 9.99999974E-6 : f32
    %129 = vector.broadcast %cst_47 : f32 to vector<8x1xf32>
    %130 = arith.addf %126, %129 : vector<8x1xf32>
    %131 = math.rsqrt %130 : vector<8x1xf32>
    %132 = vector.broadcast %131 : vector<8x1xf32> to vector<8x32xf32>
    %133 = arith.mulf %128, %132 : vector<8x32xf32>
    %134 = vector.broadcast %114 : vector<1x32xf32> to vector<8x32xf32>
    %135 = arith.mulf %133, %134 : vector<8x32xf32>
    %136 = vector.broadcast %115 : vector<1x32xf32> to vector<8x32xf32>
    %137 = arith.addf %135, %136 : vector<8x32xf32>
    %138 = arith.truncf %137 : vector<8x32xf32> to vector<8x32xbf16>
    %c0_48 = arith.constant 0 : index
    %c0_49 = arith.constant 0 : index
    %c0_50 = arith.constant 0 : index
    %139 = vector.load %arg15[%c0_48, %c0_49, %c0_50] : memref<1x8x32xbf16, #tpu.memory_space<vmem>>, vector<1x8x32xbf16>
    %140 = vector.shape_cast %139 : vector<1x8x32xbf16> to vector<8x32xbf16>
    %141 = vector.shape_cast %138 : vector<8x32xbf16> to vector<1x8x32xbf16>
    tpu.vector_store %arg15[%c0_48, %c0_49, %c0_50], %141 {strides = array<i32>} : memref<1x8x32xbf16, #tpu.memory_space<vmem>>, vector<1x8x32xbf16>,
    return
  }
  func.func @transform_0(%arg0: i32) -> (i32, i32, i32) {
    %c0_i32 = arith.constant 0 : i32
    %c0_i32_0 = arith.constant 0 : i32
    %c0_i32_1 = arith.constant 0 : i32
    return %arg0, %c0_i32, %c0_i32_0 : i32, i32, i32
  }
  func.func @transform_1(%arg0: i32) -> (i32, i32, i32) {
    %c0_i32 = arith.constant 0 : i32
    %c0_i32_0 = arith.constant 0 : i32
    %c0_i32_1 = arith.constant 0 : i32
    return %arg0, %c0_i32, %c0_i32_0 : i32, i32, i32
  }
  func.func @transform_2(%arg0: i32) -> (i32, i32) {
    %c0_i32 = arith.constant 0 : i32
    %c0_i32_0 = arith.constant 0 : i32
    %c0_i32_1 = arith.constant 0 : i32
    return %c0_i32, %c0_i32_0 : i32, i32
  }
  func.func @transform_3(%arg0: i32) -> (i32, i32) {
    %c0_i32 = arith.constant 0 : i32
    %c0_i32_0 = arith.constant 0 : i32
    %c0_i32_1 = arith.constant 0 : i32
    return %c0_i32, %c0_i32_0 : i32, i32
  }
  func.func @transform_4(%arg0: i32) -> (i32, i32) {
    %c0_i32 = arith.constant 0 : i32
    %c0_i32_0 = arith.constant 0 : i32
    %c0_i32_1 = arith.constant 0 : i32
    return %c0_i32, %c0_i32_0 : i32, i32
  }
  func.func @transform_5(%arg0: i32) -> (i32, i32) {
    %c0_i32 = arith.constant 0 : i32
    %c0_i32_0 = arith.constant 0 : i32
    %c0_i32_1 = arith.constant 0 : i32
    return %c0_i32, %c0_i32_0 : i32, i32
  }
  func.func @transform_6(%arg0: i32) -> (i32, i32) {
    %c0_i32 = arith.constant 0 : i32
    %c0_i32_0 = arith.constant 0 : i32
    %c0_i32_1 = arith.constant 0 : i32
    return %c0_i32, %c0_i32_0 : i32, i32
  }
  func.func @transform_7(%arg0: i32) -> (i32, i32) {
    %c0_i32 = arith.constant 0 : i32
    %c0_i32_0 = arith.constant 0 : i32
    %c0_i32_1 = arith.constant 0 : i32
    return %c0_i32, %c0_i32_0 : i32, i32
  }
  func.func @transform_8(%arg0: i32) -> (i32, i32) {
    %c0_i32 = arith.constant 0 : i32
    %c0_i32_0 = arith.constant 0 : i32
    %c0_i32_1 = arith.constant 0 : i32
    return %c0_i32, %c0_i32_0 : i32, i32
  }
  func.func @transform_9(%arg0: i32) -> (i32, i32) {
    %c0_i32 = arith.constant 0 : i32
    %c0_i32_0 = arith.constant 0 : i32
    %c0_i32_1 = arith.constant 0 : i32
    return %c0_i32, %c0_i32_0 : i32, i32
  }
  func.func @transform_10(%arg0: i32) -> (i32, i32) {
    %c0_i32 = arith.constant 0 : i32
    %c0_i32_0 = arith.constant 0 : i32
    %c0_i32_1 = arith.constant 0 : i32
    return %c0_i32, %c0_i32_0 : i32, i32
  }
  func.func @transform_11(%arg0: i32) -> (i32, i32) {
    %c0_i32 = arith.constant 0 : i32
    %c0_i32_0 = arith.constant 0 : i32
    %c0_i32_1 = arith.constant 0 : i32
    return %c0_i32, %c0_i32_0 : i32, i32
  }
  func.func @transform_12(%arg0: i32) -> (i32, i32) {
    %c0_i32 = arith.constant 0 : i32
    %c0_i32_0 = arith.constant 0 : i32
    %c0_i32_1 = arith.constant 0 : i32
    return %c0_i32, %c0_i32_0 : i32, i32
  }
  func.func @transform_13(%arg0: i32) -> (i32, i32) {
    %c0_i32 = arith.constant 0 : i32
    %c0_i32_0 = arith.constant 0 : i32
    %c0_i32_1 = arith.constant 0 : i32
    return %c0_i32, %c0_i32_0 : i32, i32
  }
  func.func @transform_14(%arg0: i32) -> (i32, i32, i32) {
    %c0_i32 = arith.constant 0 : i32
    %c0_i32_0 = arith.constant 0 : i32
    %c0_i32_1 = arith.constant 0 : i32
    return %arg0, %c0_i32, %c0_i32_0 : i32, i32, i32
  }
}

module attributes {stable_mosaic.version = 11 : i64} {
  func.func @_decoder_layer_kernel(%arg0: i32, %arg1: memref<1x8x32xbf16, #tpu.memory_space<vmem>>, %arg2: memref<1x8x32xbf16, #tpu.memory_space<vmem>>, %arg3: memref<1x1x8xf32, #tpu.memory_space<vmem>>, %arg4: memref<32x96xbf16, #tpu.memory_space<vmem>>, %arg5: memref<1x96xf32, #tpu.memory_space<vmem>>, %arg6: memref<32x32xbf16, #tpu.memory_space<vmem>>, %arg7: memref<1x32xf32, #tpu.memory_space<vmem>>, %arg8: memref<1x32xf32, #tpu.memory_space<vmem>>, %arg9: memref<1x32xf32, #tpu.memory_space<vmem>>, %arg10: memref<32x96xbf16, #tpu.memory_space<vmem>>, %arg11: memref<1x96xf32, #tpu.memory_space<vmem>>, %arg12: memref<32x32xbf16, #tpu.memory_space<vmem>>, %arg13: memref<1x32xf32, #tpu.memory_space<vmem>>, %arg14: memref<1x32xf32, #tpu.memory_space<vmem>>, %arg15: memref<1x32xf32, #tpu.memory_space<vmem>>, %arg16: memref<32x64xbf16, #tpu.memory_space<vmem>>, %arg17: memref<1x64xf32, #tpu.memory_space<vmem>>, %arg18: memref<64x32xbf16, #tpu.memory_space<vmem>>, %arg19: memref<1x32xf32, #tpu.memory_space<vmem>>, %arg20: memref<1x32xf32, #tpu.memory_space<vmem>>, %arg21: memref<1x32xf32, #tpu.memory_space<vmem>>, %arg22: memref<1x8x32xbf16, #tpu.memory_space<vmem>>) attributes {dimension_semantics = [#tpu.dimension_semantics<parallel>], iteration_bounds = array<i64: 2>, scalar_prefetch = 0 : i64, scratch_operands = 0 : i64, tpu.core_type = #tpu.core_type<tc>, window_params = [{transform_indices = @transform_0, window_bounds = array<i64: 1, 8, 32>}, {transform_indices = @transform_1, window_bounds = array<i64: 1, 8, 32>}, {transform_indices = @transform_2, window_bounds = array<i64: 1, 1, 8>}, {pipeline_mode = #tpu.pipeline_mode<synchronous>, transform_indices = @transform_3, window_bounds = array<i64: 32, 96>}, {pipeline_mode = #tpu.pipeline_mode<synchronous>, transform_indices = @transform_4, window_bounds = array<i64: 1, 96>}, {pipeline_mode = #tpu.pipeline_mode<synchronous>, transform_indices = @transform_5, window_bounds = array<i64: 32, 32>}, {pipeline_mode = #tpu.pipeline_mode<synchronous>, transform_indices = @transform_6, window_bounds = array<i64: 1, 32>}, {pipeline_mode = #tpu.pipeline_mode<synchronous>, transform_indices = @transform_7, window_bounds = array<i64: 1, 32>}, {pipeline_mode = #tpu.pipeline_mode<synchronous>, transform_indices = @transform_8, window_bounds = array<i64: 1, 32>}, {pipeline_mode = #tpu.pipeline_mode<synchronous>, transform_indices = @transform_9, window_bounds = array<i64: 32, 96>}, {pipeline_mode = #tpu.pipeline_mode<synchronous>, transform_indices = @transform_10, window_bounds = array<i64: 1, 96>}, {pipeline_mode = #tpu.pipeline_mode<synchronous>, transform_indices = @transform_11, window_bounds = array<i64: 32, 32>}, {pipeline_mode = #tpu.pipeline_mode<synchronous>, transform_indices = @transform_12, window_bounds = array<i64: 1, 32>}, {pipeline_mode = #tpu.pipeline_mode<synchronous>, transform_indices = @transform_13, window_bounds = array<i64: 1, 32>}, {pipeline_mode = #tpu.pipeline_mode<synchronous>, transform_indices = @transform_14, window_bounds = array<i64: 1, 32>}, {pipeline_mode = #tpu.pipeline_mode<synchronous>, transform_indices = @transform_15, window_bounds = array<i64: 32, 64>}, {pipeline_mode = #tpu.pipeline_mode<synchronous>, transform_indices = @transform_16, window_bounds = array<i64: 1, 64>}, {pipeline_mode = #tpu.pipeline_mode<synchronous>, transform_indices = @transform_17, window_bounds = array<i64: 64, 32>}, {pipeline_mode = #tpu.pipeline_mode<synchronous>, transform_indices = @transform_18, window_bounds = array<i64: 1, 32>}, {pipeline_mode = #tpu.pipeline_mode<synchronous>, transform_indices = @transform_19, window_bounds = array<i64: 1, 32>}, {pipeline_mode = #tpu.pipeline_mode<synchronous>, transform_indices = @transform_20, window_bounds = array<i64: 1, 32>}, {transform_indices = @transform_21, window_bounds = array<i64: 1, 8, 32>}]} {
    %c0 = arith.constant 0 : index
    %c0_0 = arith.constant 0 : index
    %c0_1 = arith.constant 0 : index
    %0 = vector.load %arg1[%c0, %c0_0, %c0_1] : memref<1x8x32xbf16, #tpu.memory_space<vmem>>, vector<1x8x32xbf16>
    %1 = vector.shape_cast %0 : vector<1x8x32xbf16> to vector<8x32xbf16>
    %c0_2 = arith.constant 0 : index
    %c0_3 = arith.constant 0 : index
    %c0_4 = arith.constant 0 : index
    %2 = vector.load %arg2[%c0_2, %c0_3, %c0_4] : memref<1x8x32xbf16, #tpu.memory_space<vmem>>, vector<1x8x32xbf16>
    %3 = vector.shape_cast %2 : vector<1x8x32xbf16> to vector<8x32xbf16>
    %4 = tpu.iota {dimensions = array<i32: 0>} : vector<8x8xi32>
    %5 = tpu.iota {dimensions = array<i32: 1>} : vector<8x8xi32>
    %6 = arith.cmpi sle, %5, %4 : vector<8x8xi32>
    %cst = arith.constant 0.000000e+00 : f32
    %cst_5 = arith.constant -1.000000e+20 : f32
    %7 = vector.broadcast %cst : f32 to vector<8x8xf32>
    %8 = vector.broadcast %cst_5 : f32 to vector<8x8xf32>
    %9 = arith.select %6, %7, %8 : vector<8x8xi1>, vector<8x8xf32>
    %10 = vector.shape_cast %9 : vector<8x8xf32> to vector<1x8x8xf32>
    %c0_6 = arith.constant 0 : index
    %c0_7 = arith.constant 0 : index
    %11 = vector.load %arg4[%c0_6, %c0_7] : memref<32x96xbf16, #tpu.memory_space<vmem>>, vector<32x96xbf16>
    %cst_8 = arith.constant dense<0.000000e+00> : vector<8x96xf32>
    %12 = tpu.matmul %1, %11, %cst_8 {dimension_numbers = #tpu.dot_dimension_numbers<[1], [0], [0], [1], [0, 0, 1, 1], [], []>} : vector<8x32xbf16>, vector<32x96xbf16>, vector<8x96xf32> -> vector<8x96xf32>
    %c0_9 = arith.constant 0 : index
    %c0_10 = arith.constant 0 : index
    %13 = vector.load %arg5[%c0_9, %c0_10] : memref<1x96xf32, #tpu.memory_space<vmem>>, vector<1x96xf32>
    %14 = vector.broadcast %13 : vector<1x96xf32> to vector<8x96xf32>
    %15 = arith.addf %12, %14 : vector<8x96xf32>
    %16 = vector.extract_strided_slice %15 {offsets = [0, 0], sizes = [8, 32], strides = [1, 1]} : vector<8x96xf32> to vector<8x32xf32>
    %cst_11 = arith.constant 0.176776692 : f32
    %17 = vector.broadcast %cst_11 : f32 to vector<8x32xf32>
    %18 = arith.mulf %16, %17 : vector<8x32xf32>
    %19 = vector.extract_strided_slice %15 {offsets = [0, 32], sizes = [8, 32], strides = [1, 1]} : vector<8x96xf32> to vector<8x32xf32>
    %20 = vector.extract_strided_slice %15 {offsets = [0, 64], sizes = [8, 32], strides = [1, 1]} : vector<8x96xf32> to vector<8x32xf32>
    %c0_12 = arith.constant 0 : index
    %c0_13 = arith.constant 0 : index
    %21 = vector.load %arg6[%c0_12, %c0_13] : memref<32x32xbf16, #tpu.memory_space<vmem>>, vector<32x32xbf16>
    %c0_14 = arith.constant 0 : index
    %c0_15 = arith.constant 0 : index
    %22 = vector.load %arg7[%c0_14, %c0_15] : memref<1x32xf32, #tpu.memory_space<vmem>>, vector<1x32xf32>
    %23 = arith.truncf %18 : vector<8x32xf32> to vector<8x32xbf16>
    %24 = arith.truncf %19 : vector<8x32xf32> to vector<8x32xbf16>
    %25 = arith.truncf %20 : vector<8x32xf32> to vector<8x32xbf16>
    %26 = vector.extract_strided_slice %23 {offsets = [0, 0], sizes = [8, 8], strides = [1, 1]} : vector<8x32xbf16> to vector<8x8xbf16>
    %27 = vector.extract_strided_slice %23 {offsets = [0, 8], sizes = [8, 8], strides = [1, 1]} : vector<8x32xbf16> to vector<8x8xbf16>
    %28 = vector.extract_strided_slice %23 {offsets = [0, 16], sizes = [8, 8], strides = [1, 1]} : vector<8x32xbf16> to vector<8x8xbf16>
    %29 = vector.extract_strided_slice %23 {offsets = [0, 24], sizes = [8, 8], strides = [1, 1]} : vector<8x32xbf16> to vector<8x8xbf16>
    %30 = vector.shape_cast %26 : vector<8x8xbf16> to vector<1x8x8xbf16>
    %31 = vector.shape_cast %27 : vector<8x8xbf16> to vector<1x8x8xbf16>
    %32 = vector.shape_cast %28 : vector<8x8xbf16> to vector<1x8x8xbf16>
    %33 = vector.shape_cast %29 : vector<8x8xbf16> to vector<1x8x8xbf16>
    %34 = tpu.concatenate %30, %31, %32, %33 in 0 : vector<1x8x8xbf16>, vector<1x8x8xbf16>, vector<1x8x8xbf16>, vector<1x8x8xbf16> -> vector<4x8x8xbf16>
    %35 = vector.extract_strided_slice %24 {offsets = [0, 0], sizes = [8, 8], strides = [1, 1]} : vector<8x32xbf16> to vector<8x8xbf16>
    %36 = vector.extract_strided_slice %24 {offsets = [0, 8], sizes = [8, 8], strides = [1, 1]} : vector<8x32xbf16> to vector<8x8xbf16>
    %37 = vector.extract_strided_slice %24 {offsets = [0, 16], sizes = [8, 8], strides = [1, 1]} : vector<8x32xbf16> to vector<8x8xbf16>
    %38 = vector.extract_strided_slice %24 {offsets = [0, 24], sizes = [8, 8], strides = [1, 1]} : vector<8x32xbf16> to vector<8x8xbf16>
    %39 = vector.shape_cast %35 : vector<8x8xbf16> to vector<1x8x8xbf16>
    %40 = vector.shape_cast %36 : vector<8x8xbf16> to vector<1x8x8xbf16>
    %41 = vector.shape_cast %37 : vector<8x8xbf16> to vector<1x8x8xbf16>
    %42 = vector.shape_cast %38 : vector<8x8xbf16> to vector<1x8x8xbf16>
    %43 = tpu.concatenate %39, %40, %41, %42 in 0 : vector<1x8x8xbf16>, vector<1x8x8xbf16>, vector<1x8x8xbf16>, vector<1x8x8xbf16> -> vector<4x8x8xbf16>
    %44 = vector.extract_strided_slice %25 {offsets = [0, 0], sizes = [8, 8], strides = [1, 1]} : vector<8x32xbf16> to vector<8x8xbf16>
    %45 = vector.extract_strided_slice %25 {offsets = [0, 8], sizes = [8, 8], strides = [1, 1]} : vector<8x32xbf16> to vector<8x8xbf16>
    %46 = vector.extract_strided_slice %25 {offsets = [0, 16], sizes = [8, 8], strides = [1, 1]} : vector<8x32xbf16> to vector<8x8xbf16>
    %47 = vector.extract_strided_slice %25 {offsets = [0, 24], sizes = [8, 8], strides = [1, 1]} : vector<8x32xbf16> to vector<8x8xbf16>
    %48 = vector.shape_cast %44 : vector<8x8xbf16> to vector<1x8x8xbf16>
    %49 = vector.shape_cast %45 : vector<8x8xbf16> to vector<1x8x8xbf16>
    %50 = vector.shape_cast %46 : vector<8x8xbf16> to vector<1x8x8xbf16>
    %51 = vector.shape_cast %47 : vector<8x8xbf16> to vector<1x8x8xbf16>
    %52 = tpu.concatenate %48, %49, %50, %51 in 0 : vector<1x8x8xbf16>, vector<1x8x8xbf16>, vector<1x8x8xbf16>, vector<1x8x8xbf16> -> vector<4x8x8xbf16>
    %cst_16 = arith.constant dense<0.000000e+00> : vector<4x8x8xf32>
    %53 = tpu.matmul %34, %43, %cst_16 {dimension_numbers = #tpu.dot_dimension_numbers<[2], [2], [1], [1], [0, 0, 0, 1, 1, 1], [0], [0]>} : vector<4x8x8xbf16>, vector<4x8x8xbf16>, vector<4x8x8xf32> -> vector<4x8x8xf32>
    %54 = vector.broadcast %10 : vector<1x8x8xf32> to vector<4x8x8xf32>
    %55 = arith.addf %53, %54 : vector<4x8x8xf32>
    %cst_17 = arith.constant dense<0xFF800000> : vector<4x8xf32>
    %56 = vector.multi_reduction <maximumf>, %55, %cst_17 [2] : vector<4x8x8xf32> to vector<4x8xf32>
    %57 = vector.shape_cast %56 : vector<4x8xf32> to vector<4x8x1xf32>
    %58 = vector.broadcast %57 : vector<4x8x1xf32> to vector<4x8x8xf32>
    %59 = arith.subf %55, %58 : vector<4x8x8xf32>
    %60 = math.exp %59 : vector<4x8x8xf32>
    %cst_18 = arith.constant dense<0.000000e+00> : vector<4x8xf32>
    %61 = vector.multi_reduction <add>, %60, %cst_18 [2] : vector<4x8x8xf32> to vector<4x8xf32>
    %62 = vector.shape_cast %61 : vector<4x8xf32> to vector<4x8x1xf32>
    %63 = tpu.reciprocal %62 {approx = true} : vector<4x8x1xf32> -> vector<4x8x1xf32>
    %64 = vector.broadcast %63 : vector<4x8x1xf32> to vector<4x8x8xf32>
    %65 = arith.mulf %60, %64 : vector<4x8x8xf32>
    %66 = arith.truncf %65 : vector<4x8x8xf32> to vector<4x8x8xbf16>
    %cst_19 = arith.constant dense<0.000000e+00> : vector<4x8x8xf32>
    %67 = tpu.matmul %66, %52, %cst_19 {dimension_numbers = #tpu.dot_dimension_numbers<[2], [1], [1], [2], [0, 0, 0, 1, 1, 2], [0], [0]>} : vector<4x8x8xbf16>, vector<4x8x8xbf16>, vector<4x8x8xf32> -> vector<4x8x8xf32>
    %68 = vector.extract_strided_slice %67 {offsets = [0, 0, 0], sizes = [1, 8, 8], strides = [1, 1, 1]} : vector<4x8x8xf32> to vector<1x8x8xf32>
    %69 = vector.shape_cast %68 : vector<1x8x8xf32> to vector<8x8xf32>
    %70 = vector.extract_strided_slice %67 {offsets = [1, 0, 0], sizes = [1, 8, 8], strides = [1, 1, 1]} : vector<4x8x8xf32> to vector<1x8x8xf32>
    %71 = vector.shape_cast %70 : vector<1x8x8xf32> to vector<8x8xf32>
    %72 = vector.extract_strided_slice %67 {offsets = [2, 0, 0], sizes = [1, 8, 8], strides = [1, 1, 1]} : vector<4x8x8xf32> to vector<1x8x8xf32>
    %73 = vector.shape_cast %72 : vector<1x8x8xf32> to vector<8x8xf32>
    %74 = vector.extract_strided_slice %67 {offsets = [3, 0, 0], sizes = [1, 8, 8], strides = [1, 1, 1]} : vector<4x8x8xf32> to vector<1x8x8xf32>
    %75 = vector.shape_cast %74 : vector<1x8x8xf32> to vector<8x8xf32>
    %76 = tpu.concatenate %69, %71, %73, %75 in 1 : vector<8x8xf32>, vector<8x8xf32>, vector<8x8xf32>, vector<8x8xf32> -> vector<8x32xf32>
    %77 = arith.truncf %76 : vector<8x32xf32> to vector<8x32xbf16>
    %cst_20 = arith.constant dense<0.000000e+00> : vector<8x32xf32>
    %78 = tpu.matmul %77, %21, %cst_20 {dimension_numbers = #tpu.dot_dimension_numbers<[1], [0], [0], [1], [0, 0, 1, 1], [], []>} : vector<8x32xbf16>, vector<32x32xbf16>, vector<8x32xf32> -> vector<8x32xf32>
    %79 = vector.broadcast %22 : vector<1x32xf32> to vector<8x32xf32>
    %80 = arith.addf %78, %79 : vector<8x32xf32>
    %81 = arith.extf %1 : vector<8x32xbf16> to vector<8x32xf32>
    %82 = arith.addf %81, %80 : vector<8x32xf32>
    %c0_21 = arith.constant 0 : index
    %c0_22 = arith.constant 0 : index
    %83 = vector.load %arg8[%c0_21, %c0_22] : memref<1x32xf32, #tpu.memory_space<vmem>>, vector<1x32xf32>
    %c0_23 = arith.constant 0 : index
    %c0_24 = arith.constant 0 : index
    %84 = vector.load %arg9[%c0_23, %c0_24] : memref<1x32xf32, #tpu.memory_space<vmem>>, vector<1x32xf32>
    %cst_25 = arith.constant dense<0.000000e+00> : vector<8xf32>
    %85 = vector.multi_reduction <add>, %82, %cst_25 [1] : vector<8x32xf32> to vector<8xf32>
    %86 = vector.shape_cast %85 : vector<8xf32> to vector<8x1xf32>
    %cst_26 = arith.constant 3.200000e+01 : f32
    %87 = vector.broadcast %cst_26 : f32 to vector<8x1xf32>
    %88 = arith.divf %86, %87 : vector<8x1xf32>
    %89 = vector.broadcast %88 : vector<8x1xf32> to vector<8x32xf32>
    %90 = arith.subf %82, %89 : vector<8x32xf32>
    %91 = arith.mulf %90, %90 : vector<8x32xf32>
    %cst_27 = arith.constant dense<0.000000e+00> : vector<8xf32>
    %92 = vector.multi_reduction <add>, %91, %cst_27 [1] : vector<8x32xf32> to vector<8xf32>
    %93 = vector.shape_cast %92 : vector<8xf32> to vector<8x1xf32>
    %cst_28 = arith.constant 3.200000e+01 : f32
    %94 = vector.broadcast %cst_28 : f32 to vector<8x1xf32>
    %95 = arith.divf %93, %94 : vector<8x1xf32>
    %96 = vector.broadcast %88 : vector<8x1xf32> to vector<8x32xf32>
    %97 = arith.subf %82, %96 : vector<8x32xf32>
    %cst_29 = arith.constant 9.99999974E-6 : f32
    %98 = vector.broadcast %cst_29 : f32 to vector<8x1xf32>
    %99 = arith.addf %95, %98 : vector<8x1xf32>
    %100 = math.rsqrt %99 : vector<8x1xf32>
    %101 = vector.broadcast %100 : vector<8x1xf32> to vector<8x32xf32>
    %102 = arith.mulf %97, %101 : vector<8x32xf32>
    %103 = vector.broadcast %83 : vector<1x32xf32> to vector<8x32xf32>
    %104 = arith.mulf %102, %103 : vector<8x32xf32>
    %105 = vector.broadcast %84 : vector<1x32xf32> to vector<8x32xf32>
    %106 = arith.addf %104, %105 : vector<8x32xf32>
    %c0_30 = arith.constant 0 : index
    %c0_31 = arith.constant 0 : index
    %107 = vector.load %arg10[%c0_30, %c0_31] : memref<32x96xbf16, #tpu.memory_space<vmem>>, vector<32x96xbf16>
    %c0_32 = arith.constant 0 : index
    %c0_33 = arith.constant 0 : index
    %108 = vector.load %arg11[%c0_32, %c0_33] : memref<1x96xf32, #tpu.memory_space<vmem>>, vector<1x96xf32>
    %109 = arith.truncf %106 : vector<8x32xf32> to vector<8x32xbf16>
    %110 = vector.extract_strided_slice %107 {offsets = [0, 0], sizes = [32, 32], strides = [1, 1]} : vector<32x96xbf16> to vector<32x32xbf16>
    %cst_34 = arith.constant dense<0.000000e+00> : vector<8x32xf32>
    %111 = tpu.matmul %109, %110, %cst_34 {dimension_numbers = #tpu.dot_dimension_numbers<[1], [0], [0], [1], [0, 0, 1, 1], [], []>} : vector<8x32xbf16>, vector<32x32xbf16>, vector<8x32xf32> -> vector<8x32xf32>
    %112 = vector.extract_strided_slice %108 {offsets = [0, 0], sizes = [1, 32], strides = [1, 1]} : vector<1x96xf32> to vector<1x32xf32>
    %113 = vector.broadcast %112 : vector<1x32xf32> to vector<8x32xf32>
    %114 = arith.addf %111, %113 : vector<8x32xf32>
    %cst_35 = arith.constant 0.176776692 : f32
    %115 = vector.broadcast %cst_35 : f32 to vector<8x32xf32>
    %116 = arith.mulf %114, %115 : vector<8x32xf32>
    %117 = vector.extract_strided_slice %107 {offsets = [0, 32], sizes = [32, 64], strides = [1, 1]} : vector<32x96xbf16> to vector<32x64xbf16>
    %cst_36 = arith.constant dense<0.000000e+00> : vector<8x64xf32>
    %118 = tpu.matmul %3, %117, %cst_36 {dimension_numbers = #tpu.dot_dimension_numbers<[1], [0], [0], [1], [0, 0, 1, 1], [], []>} : vector<8x32xbf16>, vector<32x64xbf16>, vector<8x64xf32> -> vector<8x64xf32>
    %119 = vector.extract_strided_slice %108 {offsets = [0, 32], sizes = [1, 64], strides = [1, 1]} : vector<1x96xf32> to vector<1x64xf32>
    %120 = vector.broadcast %119 : vector<1x64xf32> to vector<8x64xf32>
    %121 = arith.addf %118, %120 : vector<8x64xf32>
    %122 = vector.extract_strided_slice %121 {offsets = [0, 0], sizes = [8, 32], strides = [1, 1]} : vector<8x64xf32> to vector<8x32xf32>
    %123 = vector.extract_strided_slice %121 {offsets = [0, 32], sizes = [8, 32], strides = [1, 1]} : vector<8x64xf32> to vector<8x32xf32>
    %c0_37 = arith.constant 0 : index
    %c0_38 = arith.constant 0 : index
    %c0_39 = arith.constant 0 : index
    %124 = vector.load %arg3[%c0_37, %c0_38, %c0_39] : memref<1x1x8xf32, #tpu.memory_space<vmem>>, vector<1x1x8xf32>
    %c0_40 = arith.constant 0 : index
    %c0_41 = arith.constant 0 : index
    %125 = vector.load %arg12[%c0_40, %c0_41] : memref<32x32xbf16, #tpu.memory_space<vmem>>, vector<32x32xbf16>
    %c0_42 = arith.constant 0 : index
    %c0_43 = arith.constant 0 : index
    %126 = vector.load %arg13[%c0_42, %c0_43] : memref<1x32xf32, #tpu.memory_space<vmem>>, vector<1x32xf32>
    %127 = arith.truncf %116 : vector<8x32xf32> to vector<8x32xbf16>
    %128 = arith.truncf %122 : vector<8x32xf32> to vector<8x32xbf16>
    %129 = arith.truncf %123 : vector<8x32xf32> to vector<8x32xbf16>
    %130 = vector.extract_strided_slice %127 {offsets = [0, 0], sizes = [8, 8], strides = [1, 1]} : vector<8x32xbf16> to vector<8x8xbf16>
    %131 = vector.extract_strided_slice %127 {offsets = [0, 8], sizes = [8, 8], strides = [1, 1]} : vector<8x32xbf16> to vector<8x8xbf16>
    %132 = vector.extract_strided_slice %127 {offsets = [0, 16], sizes = [8, 8], strides = [1, 1]} : vector<8x32xbf16> to vector<8x8xbf16>
    %133 = vector.extract_strided_slice %127 {offsets = [0, 24], sizes = [8, 8], strides = [1, 1]} : vector<8x32xbf16> to vector<8x8xbf16>
    %134 = vector.shape_cast %130 : vector<8x8xbf16> to vector<1x8x8xbf16>
    %135 = vector.shape_cast %131 : vector<8x8xbf16> to vector<1x8x8xbf16>
    %136 = vector.shape_cast %132 : vector<8x8xbf16> to vector<1x8x8xbf16>
    %137 = vector.shape_cast %133 : vector<8x8xbf16> to vector<1x8x8xbf16>
    %138 = tpu.concatenate %134, %135, %136, %137 in 0 : vector<1x8x8xbf16>, vector<1x8x8xbf16>, vector<1x8x8xbf16>, vector<1x8x8xbf16> -> vector<4x8x8xbf16>
    %139 = vector.extract_strided_slice %128 {offsets = [0, 0], sizes = [8, 8], strides = [1, 1]} : vector<8x32xbf16> to vector<8x8xbf16>
    %140 = vector.extract_strided_slice %128 {offsets = [0, 8], sizes = [8, 8], strides = [1, 1]} : vector<8x32xbf16> to vector<8x8xbf16>
    %141 = vector.extract_strided_slice %128 {offsets = [0, 16], sizes = [8, 8], strides = [1, 1]} : vector<8x32xbf16> to vector<8x8xbf16>
    %142 = vector.extract_strided_slice %128 {offsets = [0, 24], sizes = [8, 8], strides = [1, 1]} : vector<8x32xbf16> to vector<8x8xbf16>
    %143 = vector.shape_cast %139 : vector<8x8xbf16> to vector<1x8x8xbf16>
    %144 = vector.shape_cast %140 : vector<8x8xbf16> to vector<1x8x8xbf16>
    %145 = vector.shape_cast %141 : vector<8x8xbf16> to vector<1x8x8xbf16>
    %146 = vector.shape_cast %142 : vector<8x8xbf16> to vector<1x8x8xbf16>
    %147 = tpu.concatenate %143, %144, %145, %146 in 0 : vector<1x8x8xbf16>, vector<1x8x8xbf16>, vector<1x8x8xbf16>, vector<1x8x8xbf16> -> vector<4x8x8xbf16>
    %148 = vector.extract_strided_slice %129 {offsets = [0, 0], sizes = [8, 8], strides = [1, 1]} : vector<8x32xbf16> to vector<8x8xbf16>
    %149 = vector.extract_strided_slice %129 {offsets = [0, 8], sizes = [8, 8], strides = [1, 1]} : vector<8x32xbf16> to vector<8x8xbf16>
    %150 = vector.extract_strided_slice %129 {offsets = [0, 16], sizes = [8, 8], strides = [1, 1]} : vector<8x32xbf16> to vector<8x8xbf16>
    %151 = vector.extract_strided_slice %129 {offsets = [0, 24], sizes = [8, 8], strides = [1, 1]} : vector<8x32xbf16> to vector<8x8xbf16>
    %152 = vector.shape_cast %148 : vector<8x8xbf16> to vector<1x8x8xbf16>
    %153 = vector.shape_cast %149 : vector<8x8xbf16> to vector<1x8x8xbf16>
    %154 = vector.shape_cast %150 : vector<8x8xbf16> to vector<1x8x8xbf16>
    %155 = vector.shape_cast %151 : vector<8x8xbf16> to vector<1x8x8xbf16>
    %156 = tpu.concatenate %152, %153, %154, %155 in 0 : vector<1x8x8xbf16>, vector<1x8x8xbf16>, vector<1x8x8xbf16>, vector<1x8x8xbf16> -> vector<4x8x8xbf16>
    %cst_44 = arith.constant dense<0.000000e+00> : vector<4x8x8xf32>
    %157 = tpu.matmul %138, %147, %cst_44 {dimension_numbers = #tpu.dot_dimension_numbers<[2], [2], [1], [1], [0, 0, 0, 1, 1, 1], [0], [0]>} : vector<4x8x8xbf16>, vector<4x8x8xbf16>, vector<4x8x8xf32> -> vector<4x8x8xf32>
    %158 = vector.broadcast %124 : vector<1x1x8xf32> to vector<4x8x8xf32>
    %159 = arith.addf %157, %158 : vector<4x8x8xf32>
    %cst_45 = arith.constant dense<0xFF800000> : vector<4x8xf32>
    %160 = vector.multi_reduction <maximumf>, %159, %cst_45 [2] : vector<4x8x8xf32> to vector<4x8xf32>
    %161 = vector.shape_cast %160 : vector<4x8xf32> to vector<4x8x1xf32>
    %162 = vector.broadcast %161 : vector<4x8x1xf32> to vector<4x8x8xf32>
    %163 = arith.subf %159, %162 : vector<4x8x8xf32>
    %164 = math.exp %163 : vector<4x8x8xf32>
    %cst_46 = arith.constant dense<0.000000e+00> : vector<4x8xf32>
    %165 = vector.multi_reduction <add>, %164, %cst_46 [2] : vector<4x8x8xf32> to vector<4x8xf32>
    %166 = vector.shape_cast %165 : vector<4x8xf32> to vector<4x8x1xf32>
    %167 = tpu.reciprocal %166 {approx = true} : vector<4x8x1xf32> -> vector<4x8x1xf32>
    %168 = vector.broadcast %167 : vector<4x8x1xf32> to vector<4x8x8xf32>
    %169 = arith.mulf %164, %168 : vector<4x8x8xf32>
    %170 = arith.truncf %169 : vector<4x8x8xf32> to vector<4x8x8xbf16>
    %cst_47 = arith.constant dense<0.000000e+00> : vector<4x8x8xf32>
    %171 = tpu.matmul %170, %156, %cst_47 {dimension_numbers = #tpu.dot_dimension_numbers<[2], [1], [1], [2], [0, 0, 0, 1, 1, 2], [0], [0]>} : vector<4x8x8xbf16>, vector<4x8x8xbf16>, vector<4x8x8xf32> -> vector<4x8x8xf32>
    %172 = vector.extract_strided_slice %171 {offsets = [0, 0, 0], sizes = [1, 8, 8], strides = [1, 1, 1]} : vector<4x8x8xf32> to vector<1x8x8xf32>
    %173 = vector.shape_cast %172 : vector<1x8x8xf32> to vector<8x8xf32>
    %174 = vector.extract_strided_slice %171 {offsets = [1, 0, 0], sizes = [1, 8, 8], strides = [1, 1, 1]} : vector<4x8x8xf32> to vector<1x8x8xf32>
    %175 = vector.shape_cast %174 : vector<1x8x8xf32> to vector<8x8xf32>
    %176 = vector.extract_strided_slice %171 {offsets = [2, 0, 0], sizes = [1, 8, 8], strides = [1, 1, 1]} : vector<4x8x8xf32> to vector<1x8x8xf32>
    %177 = vector.shape_cast %176 : vector<1x8x8xf32> to vector<8x8xf32>
    %178 = vector.extract_strided_slice %171 {offsets = [3, 0, 0], sizes = [1, 8, 8], strides = [1, 1, 1]} : vector<4x8x8xf32> to vector<1x8x8xf32>
    %179 = vector.shape_cast %178 : vector<1x8x8xf32> to vector<8x8xf32>
    %180 = tpu.concatenate %173, %175, %177, %179 in 1 : vector<8x8xf32>, vector<8x8xf32>, vector<8x8xf32>, vector<8x8xf32> -> vector<8x32xf32>
    %181 = arith.truncf %180 : vector<8x32xf32> to vector<8x32xbf16>
    %cst_48 = arith.constant dense<0.000000e+00> : vector<8x32xf32>
    %182 = tpu.matmul %181, %125, %cst_48 {dimension_numbers = #tpu.dot_dimension_numbers<[1], [0], [0], [1], [0, 0, 1, 1], [], []>} : vector<8x32xbf16>, vector<32x32xbf16>, vector<8x32xf32> -> vector<8x32xf32>
    %183 = vector.broadcast %126 : vector<1x32xf32> to vector<8x32xf32>
    %184 = arith.addf %182, %183 : vector<8x32xf32>
    %185 = arith.addf %106, %184 : vector<8x32xf32>
    %c0_49 = arith.constant 0 : index
    %c0_50 = arith.constant 0 : index
    %186 = vector.load %arg14[%c0_49, %c0_50] : memref<1x32xf32, #tpu.memory_space<vmem>>, vector<1x32xf32>
    %c0_51 = arith.constant 0 : index
    %c0_52 = arith.constant 0 : index
    %187 = vector.load %arg15[%c0_51, %c0_52] : memref<1x32xf32, #tpu.memory_space<vmem>>, vector<1x32xf32>
    %cst_53 = arith.constant dense<0.000000e+00> : vector<8xf32>
    %188 = vector.multi_reduction <add>, %185, %cst_53 [1] : vector<8x32xf32> to vector<8xf32>
    %189 = vector.shape_cast %188 : vector<8xf32> to vector<8x1xf32>
    %cst_54 = arith.constant 3.200000e+01 : f32
    %190 = vector.broadcast %cst_54 : f32 to vector<8x1xf32>
    %191 = arith.divf %189, %190 : vector<8x1xf32>
    %192 = vector.broadcast %191 : vector<8x1xf32> to vector<8x32xf32>
    %193 = arith.subf %185, %192 : vector<8x32xf32>
    %194 = arith.mulf %193, %193 : vector<8x32xf32>
    %cst_55 = arith.constant dense<0.000000e+00> : vector<8xf32>
    %195 = vector.multi_reduction <add>, %194, %cst_55 [1] : vector<8x32xf32> to vector<8xf32>
    %196 = vector.shape_cast %195 : vector<8xf32> to vector<8x1xf32>
    %cst_56 = arith.constant 3.200000e+01 : f32
    %197 = vector.broadcast %cst_56 : f32 to vector<8x1xf32>
    %198 = arith.divf %196, %197 : vector<8x1xf32>
    %199 = vector.broadcast %191 : vector<8x1xf32> to vector<8x32xf32>
    %200 = arith.subf %185, %199 : vector<8x32xf32>
    %cst_57 = arith.constant 9.99999974E-6 : f32
    %201 = vector.broadcast %cst_57 : f32 to vector<8x1xf32>
    %202 = arith.addf %198, %201 : vector<8x1xf32>
    %203 = math.rsqrt %202 : vector<8x1xf32>
    %204 = vector.broadcast %203 : vector<8x1xf32> to vector<8x32xf32>
    %205 = arith.mulf %200, %204 : vector<8x32xf32>
    %206 = vector.broadcast %186 : vector<1x32xf32> to vector<8x32xf32>
    %207 = arith.mulf %205, %206 : vector<8x32xf32>
    %208 = vector.broadcast %187 : vector<1x32xf32> to vector<8x32xf32>
    %209 = arith.addf %207, %208 : vector<8x32xf32>
    %210 = arith.truncf %209 : vector<8x32xf32> to vector<8x32xbf16>
    %c0_58 = arith.constant 0 : index
    %c0_59 = arith.constant 0 : index
    %211 = vector.load %arg16[%c0_58, %c0_59] : memref<32x64xbf16, #tpu.memory_space<vmem>>, vector<32x64xbf16>
    %cst_60 = arith.constant dense<0.000000e+00> : vector<8x64xf32>
    %212 = tpu.matmul %210, %211, %cst_60 {dimension_numbers = #tpu.dot_dimension_numbers<[1], [0], [0], [1], [0, 0, 1, 1], [], []>} : vector<8x32xbf16>, vector<32x64xbf16>, vector<8x64xf32> -> vector<8x64xf32>
    %c0_61 = arith.constant 0 : index
    %c0_62 = arith.constant 0 : index
    %213 = vector.load %arg17[%c0_61, %c0_62] : memref<1x64xf32, #tpu.memory_space<vmem>>, vector<1x64xf32>
    %214 = vector.broadcast %213 : vector<1x64xf32> to vector<8x64xf32>
    %215 = arith.addf %212, %214 : vector<8x64xf32>
    %cst_63 = arith.constant 0.000000e+00 : f32
    %216 = vector.broadcast %cst_63 : f32 to vector<8x64xf32>
    %217 = arith.maximumf %215, %216 : vector<8x64xf32>
    %218 = arith.truncf %217 : vector<8x64xf32> to vector<8x64xbf16>
    %c0_64 = arith.constant 0 : index
    %c0_65 = arith.constant 0 : index
    %219 = vector.load %arg18[%c0_64, %c0_65] : memref<64x32xbf16, #tpu.memory_space<vmem>>, vector<64x32xbf16>
    %cst_66 = arith.constant dense<0.000000e+00> : vector<8x32xf32>
    %220 = tpu.matmul %218, %219, %cst_66 {dimension_numbers = #tpu.dot_dimension_numbers<[1], [0], [0], [1], [0, 0, 1, 1], [], []>} : vector<8x64xbf16>, vector<64x32xbf16>, vector<8x32xf32> -> vector<8x32xf32>
    %c0_67 = arith.constant 0 : index
    %c0_68 = arith.constant 0 : index
    %221 = vector.load %arg19[%c0_67, %c0_68] : memref<1x32xf32, #tpu.memory_space<vmem>>, vector<1x32xf32>
    %222 = vector.broadcast %221 : vector<1x32xf32> to vector<8x32xf32>
    %223 = arith.addf %220, %222 : vector<8x32xf32>
    %224 = arith.addf %209, %223 : vector<8x32xf32>
    %c0_69 = arith.constant 0 : index
    %c0_70 = arith.constant 0 : index
    %225 = vector.load %arg20[%c0_69, %c0_70] : memref<1x32xf32, #tpu.memory_space<vmem>>, vector<1x32xf32>
    %c0_71 = arith.constant 0 : index
    %c0_72 = arith.constant 0 : index
    %226 = vector.load %arg21[%c0_71, %c0_72] : memref<1x32xf32, #tpu.memory_space<vmem>>, vector<1x32xf32>
    %cst_73 = arith.constant dense<0.000000e+00> : vector<8xf32>
    %227 = vector.multi_reduction <add>, %224, %cst_73 [1] : vector<8x32xf32> to vector<8xf32>
    %228 = vector.shape_cast %227 : vector<8xf32> to vector<8x1xf32>
    %cst_74 = arith.constant 3.200000e+01 : f32
    %229 = vector.broadcast %cst_74 : f32 to vector<8x1xf32>
    %230 = arith.divf %228, %229 : vector<8x1xf32>
    %231 = vector.broadcast %230 : vector<8x1xf32> to vector<8x32xf32>
    %232 = arith.subf %224, %231 : vector<8x32xf32>
    %233 = arith.mulf %232, %232 : vector<8x32xf32>
    %cst_75 = arith.constant dense<0.000000e+00> : vector<8xf32>
    %234 = vector.multi_reduction <add>, %233, %cst_75 [1] : vector<8x32xf32> to vector<8xf32>
    %235 = vector.shape_cast %234 : vector<8xf32> to vector<8x1xf32>
    %cst_76 = arith.constant 3.200000e+01 : f32
    %236 = vector.broadcast %cst_76 : f32 to vector<8x1xf32>
    %237 = arith.divf %235, %236 : vector<8x1xf32>
    %238 = vector.broadcast %230 : vector<8x1xf32> to vector<8x32xf32>
    %239 = arith.subf %224, %238 : vector<8x32xf32>
    %cst_77 = arith.constant 9.99999974E-6 : f32
    %240 = vector.broadcast %cst_77 : f32 to vector<8x1xf32>
    %241 = arith.addf %237, %240 : vector<8x1xf32>
    %242 = math.rsqrt %241 : vector<8x1xf32>
    %243 = vector.broadcast %242 : vector<8x1xf32> to vector<8x32xf32>
    %244 = arith.mulf %239, %243 : vector<8x32xf32>
    %245 = vector.broadcast %225 : vector<1x32xf32> to vector<8x32xf32>
    %246 = arith.mulf %244, %245 : vector<8x32xf32>
    %247 = vector.broadcast %226 : vector<1x32xf32> to vector<8x32xf32>
    %248 = arith.addf %246, %247 : vector<8x32xf32>
    %249 = arith.truncf %248 : vector<8x32xf32> to vector<8x32xbf16>
    %c0_78 = arith.constant 0 : index
    %c0_79 = arith.constant 0 : index
    %c0_80 = arith.constant 0 : index
    %250 = vector.load %arg22[%c0_78, %c0_79, %c0_80] : memref<1x8x32xbf16, #tpu.memory_space<vmem>>, vector<1x8x32xbf16>
    %251 = vector.shape_cast %250 : vector<1x8x32xbf16> to vector<8x32xbf16>
    %252 = vector.shape_cast %249 : vector<8x32xbf16> to vector<1x8x32xbf16>
    tpu.vector_store %arg22[%c0_78, %c0_79, %c0_80], %252 {strides = array<i32>} : memref<1x8x32xbf16, #tpu.memory_space<vmem>>, vector<1x8x32xbf16>,
    return
  }
  func.func @transform_0(%arg0: i32) -> (i32, i32, i32) {
    %c0_i32 = arith.constant 0 : i32
    %c0_i32_0 = arith.constant 0 : i32
    %c0_i32_1 = arith.constant 0 : i32
    return %arg0, %c0_i32, %c0_i32_0 : i32, i32, i32
  }
  func.func @transform_1(%arg0: i32) -> (i32, i32, i32) {
    %c0_i32 = arith.constant 0 : i32
    %c0_i32_0 = arith.constant 0 : i32
    %c0_i32_1 = arith.constant 0 : i32
    return %arg0, %c0_i32, %c0_i32_0 : i32, i32, i32
  }
  func.func @transform_2(%arg0: i32) -> (i32, i32, i32) {
    %c0_i32 = arith.constant 0 : i32
    %c0_i32_0 = arith.constant 0 : i32
    %c0_i32_1 = arith.constant 0 : i32
    return %arg0, %c0_i32, %c0_i32_0 : i32, i32, i32
  }
  func.func @transform_3(%arg0: i32) -> (i32, i32) {
    %c0_i32 = arith.constant 0 : i32
    %c0_i32_0 = arith.constant 0 : i32
    %c0_i32_1 = arith.constant 0 : i32
    return %c0_i32, %c0_i32_0 : i32, i32
  }
  func.func @transform_4(%arg0: i32) -> (i32, i32) {
    %c0_i32 = arith.constant 0 : i32
    %c0_i32_0 = arith.constant 0 : i32
    %c0_i32_1 = arith.constant 0 : i32
    return %c0_i32, %c0_i32_0 : i32, i32
  }
  func.func @transform_5(%arg0: i32) -> (i32, i32) {
    %c0_i32 = arith.constant 0 : i32
    %c0_i32_0 = arith.constant 0 : i32
    %c0_i32_1 = arith.constant 0 : i32
    return %c0_i32, %c0_i32_0 : i32, i32
  }
  func.func @transform_6(%arg0: i32) -> (i32, i32) {
    %c0_i32 = arith.constant 0 : i32
    %c0_i32_0 = arith.constant 0 : i32
    %c0_i32_1 = arith.constant 0 : i32
    return %c0_i32, %c0_i32_0 : i32, i32
  }
  func.func @transform_7(%arg0: i32) -> (i32, i32) {
    %c0_i32 = arith.constant 0 : i32
    %c0_i32_0 = arith.constant 0 : i32
    %c0_i32_1 = arith.constant 0 : i32
    return %c0_i32, %c0_i32_0 : i32, i32
  }
  func.func @transform_8(%arg0: i32) -> (i32, i32) {
    %c0_i32 = arith.constant 0 : i32
    %c0_i32_0 = arith.constant 0 : i32
    %c0_i32_1 = arith.constant 0 : i32
    return %c0_i32, %c0_i32_0 : i32, i32
  }
  func.func @transform_9(%arg0: i32) -> (i32, i32) {
    %c0_i32 = arith.constant 0 : i32
    %c0_i32_0 = arith.constant 0 : i32
    %c0_i32_1 = arith.constant 0 : i32
    return %c0_i32, %c0_i32_0 : i32, i32
  }
  func.func @transform_10(%arg0: i32) -> (i32, i32) {
    %c0_i32 = arith.constant 0 : i32
    %c0_i32_0 = arith.constant 0 : i32
    %c0_i32_1 = arith.constant 0 : i32
    return %c0_i32, %c0_i32_0 : i32, i32
  }
  func.func @transform_11(%arg0: i32) -> (i32, i32) {
    %c0_i32 = arith.constant 0 : i32
    %c0_i32_0 = arith.constant 0 : i32
    %c0_i32_1 = arith.constant 0 : i32
    return %c0_i32, %c0_i32_0 : i32, i32
  }
  func.func @transform_12(%arg0: i32) -> (i32, i32) {
    %c0_i32 = arith.constant 0 : i32
    %c0_i32_0 = arith.constant 0 : i32
    %c0_i32_1 = arith.constant 0 : i32
    return %c0_i32, %c0_i32_0 : i32, i32
  }
  func.func @transform_13(%arg0: i32) -> (i32, i32) {
    %c0_i32 = arith.constant 0 : i32
    %c0_i32_0 = arith.constant 0 : i32
    %c0_i32_1 = arith.constant 0 : i32
    return %c0_i32, %c0_i32_0 : i32, i32
  }
  func.func @transform_14(%arg0: i32) -> (i32, i32) {
    %c0_i32 = arith.constant 0 : i32
    %c0_i32_0 = arith.constant 0 : i32
    %c0_i32_1 = arith.constant 0 : i32
    return %c0_i32, %c0_i32_0 : i32, i32
  }
  func.func @transform_15(%arg0: i32) -> (i32, i32) {
    %c0_i32 = arith.constant 0 : i32
    %c0_i32_0 = arith.constant 0 : i32
    %c0_i32_1 = arith.constant 0 : i32
    return %c0_i32, %c0_i32_0 : i32, i32
  }
  func.func @transform_16(%arg0: i32) -> (i32, i32) {
    %c0_i32 = arith.constant 0 : i32
    %c0_i32_0 = arith.constant 0 : i32
    %c0_i32_1 = arith.constant 0 : i32
    return %c0_i32, %c0_i32_0 : i32, i32
  }
  func.func @transform_17(%arg0: i32) -> (i32, i32) {
    %c0_i32 = arith.constant 0 : i32
    %c0_i32_0 = arith.constant 0 : i32
    %c0_i32_1 = arith.constant 0 : i32
    return %c0_i32, %c0_i32_0 : i32, i32
  }
  func.func @transform_18(%arg0: i32) -> (i32, i32) {
    %c0_i32 = arith.constant 0 : i32
    %c0_i32_0 = arith.constant 0 : i32
    %c0_i32_1 = arith.constant 0 : i32
    return %c0_i32, %c0_i32_0 : i32, i32
  }
  func.func @transform_19(%arg0: i32) -> (i32, i32) {
    %c0_i32 = arith.constant 0 : i32
    %c0_i32_0 = arith.constant 0 : i32
    %c0_i32_1 = arith.constant 0 : i32
    return %c0_i32, %c0_i32_0 : i32, i32
  }
  func.func @transform_20(%arg0: i32) -> (i32, i32) {
    %c0_i32 = arith.constant 0 : i32
    %c0_i32_0 = arith.constant 0 : i32
    %c0_i32_1 = arith.constant 0 : i32
    return %c0_i32, %c0_i32_0 : i32, i32
  }
  func.func @transform_21(%arg0: i32) -> (i32, i32, i32) {
    %c0_i32 = arith.constant 0 : i32
    %c0_i32_0 = arith.constant 0 : i32
    %c0_i32_1 = arith.constant 0 : i32
    return %arg0, %c0_i32, %c0_i32_0 : i32, i32, i32
  }
}

</mosaic_0001>

<bundles_post_ra>
// kernel: transformer_forward.9
= control target key start
LH: loop header
LB: loop body
LE: loop exit
PB: predicated region body
PF: predicated region fallthrough
CT: control target
= control target key end

     0   :  { %v117_v0 = vmov 0.0   ;;  %vm118_vm0 = vmmov 0   ;;  %vm45_vm1 = vcmask 261120   ;;  %s157_s1 = inlined_call_operand.vmem [shape: bf16[32,128], index: 1, kind: input, shape index: {}]   ;;  %s158_s0 = inlined_call_operand.vmem [shape: bf16[16,32], index: 0, kind: input, shape index: {}]   ;;  %s159_s2 = inlined_call_operand.vmem [shape: f32[1,128], index: 2, kind: input, shape index: {}]   ;;  %s160_s3 = inlined_call_operand.vmem [shape: f32[16,128], index: 3, kind: output, shape index: {}]  }
   0x1   :  { %104 = vmatprep.subr.bf16.mxu0 %v117_v0  ;;  %v114_v1 = vld [vmem:[%s157_s1] sm:$0xff]   ;;  %108 = vmatprep.mubr.msk.bf16.mxu0 %vm118_vm0, %v117_v0  ;;  %v115_v2 = vld [vmem:[%s157_s1 + $0x8] sm:$0xff]  }
   0x2   :  { %105 = vmatpush3.bf16.msra.mxu0 %v114_v1  ;;  %v116_v3 = vld [vmem:[%s158_s0] sm:$0xff]  }
   0x3   :  { %106 = vmatprep.subr.bf16.mxu0 %v117_v0  ;;  %v96_v4 = vld [vmem:[%s159_s2] ss:$0 sm:$0xff] }
   0x6   :  { %107 = vmatpush3.bf16.msra.mxu0 %v115_v2 }
   0x9   :  { %109 = vmatmul.mubr.msk.bf16.vlgmr.msra.gmra.mrb[0].mxu0 %vm45_vm1, %v116_v3 }
  0xdc   :  { %v83_v5 = vpop.f32.mrb[0].mxu0 }
  0xdd   :  { %v84_v6 = vadd.f32 %v96_v4, %v83_v5  ;;  %v110_v7 = vpop.f32.mrb[1].mxu0 }
  0xde   :  { %v86_v8 = vpop.f32.mrb[2].mxu0 }
  0xdf   :  { %90 = vst [vmem:[%s160_s3] sm:$0xff] %v84_v6  ;;  %v87_v9 = vadd.f32 %v96_v4, %v86_v8  ;;  %v111_v10 = vpop.f32.mrb[3].mxu0 }
  0xe1   :  { %91 = vst [vmem:[%s160_s3 + $0x8] sm:$0xff] %v87_v9 }

// kernel: transformer_forward.5
= control target key start
LH: loop header
LB: loop body
LE: loop exit
PB: predicated region body
PF: predicated region fallthrough
CT: control target
= control target key end

     0   :  { %s1662_s29 = smov 0   ;;  %s1845_s0 = inlined_call_operand.vmem [shape: bf16[2,8,32], index: 0, kind: input, shape index: {}]   ;;  %s1846_s1 = inlined_call_operand.vmem [shape: f32[2,1,8], index: 1, kind: input, shape index: {}]   ;;  %s1847_s2 = inlined_call_operand.vmem [shape: bf16[32,96], index: 2, kind: input, shape index: {}]   ;;  %s1848_s3 = inlined_call_operand.vmem [shape: f32[1,96], index: 3, kind: input, shape index: {}]   ;;  %s1849_s4 = inlined_call_operand.vmem [shape: bf16[32,32], index: 4, kind: input, shape index: {}]   ;;  %s1850_s5 = inlined_call_operand.vmem [shape: f32[1,32], index: 5, kind: input, shape index: {}]   ;;  %s1851_s6 = inlined_call_operand.vmem [shape: f32[1,32], index: 6, kind: input, shape index: {}]   ;;  %s1852_s7 = inlined_call_operand.vmem [shape: f32[1,32], index: 7, kind: input, shape index: {}]   ;;  %s1853_s8 = inlined_call_operand.vmem [shape: bf16[32,64], index: 8, kind: input, shape index: {}]   ;;  %s1854_s9 = inlined_call_operand.vmem [shape: f32[1,64], index: 9, kind: input, shape index: {}]   ;;  %s1855_s10 = inlined_call_operand.vmem [shape: bf16[64,32], index: 10, kind: input, shape index: {}]   ;;  %s1856_s11 = inlined_call_operand.vmem [shape: f32[1,32], index: 11, kind: input, shape index: {}]   ;;  %s1857_s12 = inlined_call_operand.vmem [shape: f32[1,32], index: 12, kind: input, shape index: {}]   ;;  %s1858_s13 = inlined_call_operand.vmem [shape: f32[1,32], index: 13, kind: input, shape index: {}]   ;;  %s1859_s14 = inlined_call_operand.vmem [shape: bf16[2,8,32], index: 14, kind: output, shape index: {}]  }
   0x1 LB: > { %s1367_s30 = sadd.s32 4294967295, %s1575_s29   ;;  %p1371_p0 = scmp.ge.s32.totalorder %s1575_s29, 1  ;;  %s1575_s29 = sphi %s1662_s29, %s24_s29  }
   0x2   : > { %p419_p1 = scmp.lt.s32.totalorder %s1575_s29, 3 }
   0x4   : > { %p420_p2 = pnand %p1371_p0, %p419_p1 }
   0x5   : > { %v1539_v0 = vld [vmem:[%s1847_s2] sm:$0xff] (!%p420_p2)   ;;  %v1577_v1 = vmov (!%p420_p2), 0.0   ;;  %v1540_v2 = vld [vmem:[%s1847_s2 + $0x8] sm:$0xff] (!%p420_p2)   ;;  %vm1578_vm0 = vmmov (!%p420_p2), 0   ;;  %p466_p3 = scmp.lt.s32.totalorder (!%p420_p2), %s1367_s30, 1  ;;  %vm502_vm1 = vcmask (!%p420_p2), 261120  }
   0x6   : > { %423 = sbr.rel (%p420_p2) target bundleno = 2621 (0xa3d), region = 76  ;;  %1437 = vmatprep.subr.bf16.mxu0 (!%p420_p2), %v1577_v1  ;;  %1445 = vmatprep.subr.bf16.mxu1 (!%p420_p2), %v1577_v1  ;;  %v1374_v4 = vld [vmem:[%s1848_s3] ss:$0 sm:$0xff] (!%p420_p2)  ;;  %s1579_s25 = smov (!%p420_p2), 104   ;;  %vm577_vm2 = vcmask (!%p420_p2), 64512   ;;  %vm821_vm3 = vcmask (!%p420_p2), 1043456  }
   0x7   : > { %1438 = vmatpush3.bf16.msra.mxu0 (!%p420_p2), %v1539_v0  ;;  %1441 = vmatprep.mubr.msk.bf16.mxu0 (!%p420_p2), %vm1578_vm0, %v1577_v1  ;;  %s1580_s26 = smov (!%p420_p2), 120   ;;  %s1581_s27 = smov (!%p420_p2), 96   ;;  %vm1022_vm4 = vcmask (!%p420_p2), 130048   ;;  %vm1024_vm5 = vcmask (!%p420_p2), 195584   ;;  %vm1228_vm6 = vcmask (!%p420_p2), 523264   ;;  %vm1303_vm7 = vcmask (!%p420_p2), 257024  }
   0x8   : > { %1439 = vmatprep.subr.bf16.mxu0 (!%p420_p2), %v1577_v1  ;;  %1447 = vmatprep.mubr.msk.bf16.mxu1 (!%p420_p2), %vm1578_vm0, %v1577_v1  ;;  %s1582_s28 = smov (!%p420_p2), 112   ;;  %s1583_s18 = smov (!%p420_p2), 64  }
   0x9   : > { %s1584_s24 = smov (!%p420_p2), 8  }
   0xb   : > { %1440 = vmatpush3.bf16.msra.mxu0 (!%p420_p2), %v1540_v2 }
   0xc   : > { %1451 = vmatprep.subr.bf16.mxu0 (!%p420_p2), %v1577_v1 }
   0xd   : > { %s1861_s30 = smov (!%p466_p3, %s1367_s30), 1 }
   0xe   : > { %s1372_s19 = sshll.u32 %s1861_s30, 2  ;;  %s472_s17 = scalar_lea.vmem %s1846_s1, %s1861_s30 }
   0xf   : > { %s469_s22 = scalar_lea.vmem %s1845_s0, %s1372_s19  ;;  %v1378_v27 = vld [vmem:[%s472_s17] ss:$0 sm:$0xff]  ;;  %s476_s15 = scalar_lea.vmem %s1859_s14, %s1372_s19 }
  0x10   : > { %v1692_v3 = vld [vmem:[%s469_s22] sm:$0xf] }
  0x11   : > { %1442 = vmatmul.mubr.msk.bf16.vlgmr.msra.gmra.mrb[0].mxu0 %vm502_vm1, %v1692_v3 }
  0x12   : > { %1453 = vmatprep.mubr.msk.bf16.mxu0 %vm1578_vm0, %v1577_v1 }
  0xe4   : > { %v540_v5 = vpop.f32.mrb[0].mxu0 }
  0xe5   : > { %v541_v6 = vadd.f32 %v1374_v4, %v540_v5  ;;  %v1443_v7 = vpop.f32.mrb[1].mxu0 }
  0xe6   : > { %v543_v8 = vpop.f32.mrb[2].mxu0 }
  0xe7   : > { %v1701_v9 = vpack.c.bf16 %v541_v6, %v541_v6  ;;  %v1444_v10 = vpop.f32.mrb[3].mxu0  ;;  %v546_v11 = vmul.f32 0.17677669, %v541_v6 }
  0xe9   : > { %567 = vrot.lane.b32.xlu1 %v1701_v9, %s1579_s25  ;;  %563 = vrot.lane.b32.xlu0 %v1701_v9, %s1580_s26  ;;  %v553_v14 = vpack.c.bf16 %v546_v11, %v546_v11 }
  0xed   : > { %575 = vrot.lane.b32.xlu1 %v1701_v9, %s1581_s27  ;;  %565 = vrot.lane.b32.xlu0 %v1701_v9, %s1582_s28 }
 0x15b   : > { %v1707_v12 = vpop.permute.xlu1 %567  ;;  %v1709_v13 = vpop.permute.xlu0 %563 }
 0x15c   : > { %624 = vrot.lane.b32.xlu0 %v1709_v13, %s1581_s27 }
 0x15f   : > { %v576_v15 = vpop.permute.xlu1 %575  ;;  %v1712_v16 = vpop.permute.xlu0 %565 }
 0x160   : > { %672 = vrot.lane.b32.xlu1 %v1712_v16, %s1581_s27  ;;  %556 = vrot.lane.b32.xlu0 %v553_v14, %s1580_s26  ;;  %v582_v17 = vsel %vm577_vm2, %v576_v15, 0  ;;  %s1586_s26 = smov 24  }
 0x161   : > { %1446 = vmatpush3.bf16.xpose.msra.mxu1 %v582_v17 }
 0x162   : > { %1457 = vmatprep.subr.bf16.mxu1 %v1577_v1 }
 0x164   : > { %720 = vrot.lane.b32.xlu1 %v1707_v12, %s1581_s27  ;;  %558 = vrot.lane.b32.xlu0 %v553_v14, %s1582_s28 }
 0x168   : > { %560 = vrot.lane.b32.xlu1 %v553_v14, %s1579_s25  ;;  %1448 = vmatmul.mubr.msk.bf16.vlgmr.msra.gmra.mrb[0].mxu1 %vm577_vm2, %v553_v14  ;;  %s1585_s25 = smov 16  }
 0x169   : > { %1459 = vmatprep.mubr.msk.bf16.mxu1 %vm1578_vm0, %v1577_v1 }
 0x1ce   : > { %v625_v18 = vpop.permute.xlu0 %624 }
 0x1cf   : > { %v630_v19 = vsel %vm577_vm2, %v625_v18, 0 }
 0x1d0   : > { %1452 = vmatpush3.bf16.xpose.msra.mxu0 %v630_v19 }
 0x1d1   : > { %1463 = vmatprep.subr.bf16.mxu0 %v1577_v1 }
 0x1d2   : > { %v673_v20 = vpop.permute.xlu1 %672  ;;  %v557_v22 = vpop.permute.xlu0 %556 }
 0x1d3   : > { %v678_v21 = vsel %vm577_vm2, %v673_v20, 0 }
 0x1d4   : > { %1458 = vmatpush3.bf16.xpose.msra.mxu1 %v678_v21 }
 0x1d5   : > { %1469 = vmatprep.subr.bf16.mxu1 %v1577_v1 }
 0x1d6   : > { %v721_v23 = vpop.permute.xlu1 %720  ;;  %v559_v25 = vpop.permute.xlu0 %558 }
 0x1d7   : > { %v726_v24 = vsel %vm577_vm2, %v721_v23, 0  ;;  %1454 = vmatmul.mubr.msk.bf16.vlgmr.msra.gmra.mrb[4].mxu0 %vm577_vm2, %v557_v22 }
 0x1d8   : > { %1464 = vmatpush3.bf16.xpose.msra.mxu0 %v726_v24  ;;  %1465 = vmatprep.mubr.msk.bf16.mxu0 %vm1578_vm0, %v1577_v1 }
 0x1d9   : > { %1475 = vmatprep.subr.bf16.mxu0 %v1577_v1 }
 0x1da   : > { %v561_v26 = vpop.permute.xlu1 %560 }
 0x1db   : > { %1460 = vmatmul.mubr.msk.bf16.vlgmr.msra.gmra.mrb[4].mxu1 %vm577_vm2, %v559_v25 }
 0x1dc   : > { %1471 = vmatprep.mubr.msk.bf16.mxu1 %vm1578_vm0, %v1577_v1 }
 0x1df   : > { %1466 = vmatmul.mubr.msk.bf16.vlgmr.msra.gmra.mrb[8].mxu0 %vm577_vm2, %v561_v26 }
 0x1e0   : > { %1477 = vmatprep.mubr.msk.bf16.mxu0 %vm1578_vm0, %v1577_v1 }
 0x23b   : > { %v618_v28 = vpop.f32.mrb[0].mxu1 }
 0x23c   : > { %v619_v29 = vadd.f32 %v1378_v27, %v618_v28  ;;  %v1449_v30 = vpop.f32.mrb[1].mxu1 }
 0x23d   : > { %v621_v31 = vpop.f32.mrb[2].mxu1 }
 0x23e   : > { %v1450_v32 = vpop.f32.mrb[3].mxu1  ;;  %v768_v33 = vsel %vm577_vm2, %v619_v29, -inf }
 0x23f   : > { %769 = vmax.xlane.f32.xlu0 %v768_v33 }
 0x2aa   : > { %v666_v34 = vpop.f32.mrb[4].mxu0 }
 0x2ab   : > { %v667_v35 = vadd.f32 %v1378_v27, %v666_v34  ;;  %v1455_v36 = vpop.f32.mrb[5].mxu0 }
 0x2ac   : > { %v669_v37 = vpop.f32.mrb[6].mxu0 }
 0x2ad   : > { %v1456_v38 = vpop.f32.mrb[7].mxu0  ;;  %v771_v39 = vsel %vm577_vm2, %v667_v35, -inf }
 0x2ae   : > { %v714_v40 = vpop.f32.mrb[4].mxu1  ;;  %772 = vmax.xlane.f32.xlu1 %v771_v39  ;;  %v1541_v38 = vld [vmem:[%s1849_s4] sm:$0xff]   ;;  %v1542_v39 = vld [vmem:[%s1849_s4 + $0x8] sm:$0xff]  }
 0x2af   : > { %v715_v41 = vadd.f32 %v1378_v27, %v714_v40  ;;  %v1461_v42 = vpop.f32.mrb[5].mxu1 }
 0x2b0   : > { %v717_v43 = vpop.f32.mrb[6].mxu1 }
 0x2b1   : > { %v1462_v44 = vpop.f32.mrb[7].mxu1  ;;  %v774_v45 = vsel %vm577_vm2, %v715_v41, -inf }
 0x2b2   : > { %775 = vmax.xlane.f32.xlu0 %v774_v45  ;;  %v762_v46 = vpop.f32.mrb[8].mxu0 }
 0x2b3   : > { %v763_v47 = vadd.f32 %v1378_v27, %v762_v46  ;;  %v1467_v48 = vpop.f32.mrb[9].mxu0 }
 0x2b4   : > { %v765_v49 = vpop.f32.mrb[10].mxu0 }
 0x2b5   : > { %v1468_v50 = vpop.f32.mrb[11].mxu0  ;;  %v777_v51 = vsel %vm577_vm2, %v763_v47, -inf }
 0x2b6   : > { %778 = vmax.xlane.f32.xlu0 %v777_v51 }
 0x2bf   : > { %816 = vrot.lane.b32.xlu1 %v1701_v9, %s1583_s18 }
 0x2cc   : > { %v770_v52 = vpop.xlane.xlu0 %769 }
 0x2cd   : > { %v780_v53 = vsub.f32 %v619_v29, %v770_v52 }
 0x2cf   : > { %v784_v54 = vmul.f32 1.442695, %v780_v53 }
 0x2d1   : > { %1549 = vpow2.f32 %v784_v54 }
 0x2db   : > { %v1550_v55 = vpop.eup %1549 }
 0x2dc   : > { %v792_v56 = vsel %vm577_vm2, %v1550_v55, 0.0 }
 0x2e3   : > { %793 = vadd.xlane.f32.xlu1 %v792_v56 }
 0x33b   : > { %v773_v57 = vpop.xlane.xlu1 %772 }
 0x33c   : > { %v781_v58 = vsub.f32 %v667_v35, %v773_v57 }
 0x33e   : > { %v786_v59 = vmul.f32 1.442695, %v781_v58 }
 0x33f   : > { %v776_v60 = vpop.xlane.xlu0 %775  ;;  %v817_v61 = vpop.permute.xlu1 %816 }
 0x340   : > { %1551 = vpow2.f32 %v786_v59  ;;  %v782_v62 = vsub.f32 %v715_v41, %v776_v60  ;;  %v823_v63 = vsel %vm821_vm3, %v817_v61, 0  ;;  %v1387_v59 = vld [vmem:[%s1850_s5] ss:$0 sm:$0xff]  ;;  %v1088_v60 = vunpack.c.l.bf16 %v1692_v3 }
 0x341   : > { %1470 = vmatpush3.bf16.msra.mxu1 %v823_v63  ;;  %v1543_v3 = vld [vmem:[%s1853_s8] sm:$0xff]  }
 0x342   : > { %v788_v0 = vmul.f32 1.442695, %v782_v62  ;;  %1481 = vmatprep.subr.bf16.mxu1 %v1577_v1 }
 0x343   : > { %v779_v2 = vpop.xlane.xlu0 %778 }
 0x344   : > { %1553 = vpow2.f32 %v788_v0  ;;  %v783_v4 = vsub.f32 %v763_v47, %v779_v2 }
 0x346   : > { %v790_v5 = vmul.f32 1.442695, %v783_v4 }
 0x348   : > { %1555 = vpow2.f32 %v790_v5 }
 0x34a   : > { %v1552_v6 = vpop.eup %1551 }
 0x34b   : > { %v795_v7 = vsel %vm577_vm2, %v1552_v6, 0.0 }
 0x34c   : > { %796 = vadd.xlane.f32.xlu0 %v795_v7 }
 0x34e   : > { %v1554_v8 = vpop.eup %1553 }
 0x34f   : > { %v798_v9 = vsel %vm577_vm2, %v1554_v8, 0.0 }
 0x350   : > { %799 = vadd.xlane.f32.xlu1 %v798_v9 }
 0x352   : > { %v1556_v10 = vpop.eup %1555 }
 0x353   : > { %v801_v11 = vsel %vm577_vm2, %v1556_v10, 0.0 }
 0x354   : > { %802 = vadd.xlane.f32.xlu0 %v801_v11  ;;  %v1544_v11 = vld [vmem:[%s1853_s8 + $0x8] sm:$0xff]  }
 0x361   : > { %913 = vrot.lane.b32.xlu1 %v1712_v16, %s1583_s18 }
 0x365   : > { %961 = vrot.lane.b32.xlu1 %v1707_v12, %s1583_s18 }
 0x36a   : > { %865 = vrot.lane.b32.xlu0 %v1709_v13, %s1583_s18 }
 0x370   : > { %v794_v14 = vpop.xlane.xlu1 %793 }
 0x371   : > { %1557 = vrcp.f32 %v794_v14  ;;  %v1545_v14 = vld [vmem:[%s1855_s10] sm:$0xff]  }
 0x37b   : > { %v1558_v15 = vpop.eup %1557 }
 0x37c   : > { %v808_v17 = vmul.f32 %v1558_v15, %v1550_v55  ;;  %v1546_v15 = vld [vmem:[%s1855_s10 + $0x8] sm:$0xff]  }
 0x37e   : > { %v812_v18 = vpack.c.bf16 %v808_v17, %v808_v17 }
 0x380   : > { %1472 = vmatmul.mubr.msk.bf16.vlgmr.msra.gmra.mrb[8].mxu1 %vm577_vm2, %v812_v18 }
 0x381   : > { %1483 = vmatprep.mubr.msk.bf16.mxu1 %vm1578_vm0, %v1577_v1 }
 0x3d9   : > { %v797_v19 = vpop.xlane.xlu0 %796 }
 0x3da   : > { %1559 = vrcp.f32 %v797_v19 }
 0x3dd   : > { %v800_v20 = vpop.xlane.xlu1 %799 }
 0x3de   : > { %1561 = vrcp.f32 %v800_v20 }
 0x3e1   : > { %v914_v16 = vpop.permute.xlu1 %913  ;;  %v803_v21 = vpop.xlane.xlu0 %802 }
 0x3e2   : > { %v919_v12 = vsel %vm821_vm3, %v914_v16, 0  ;;  %1563 = vrcp.f32 %v803_v21  ;;  %v1391_v16 = vld [vmem:[%s1851_s6] ss:$0 sm:$0xff] }
 0x3e3   : > { %1482 = vmatpush3.bf16.msra.mxu1 %v919_v12  ;;  %v1392_v12 = vld [vmem:[%s1852_s7] ss:$0 sm:$0xff] }
 0x3e4   : > { %v1560_v13 = vpop.eup %1559  ;;  %1493 = vmatprep.subr.bf16.mxu1 %v1577_v1 }
 0x3e5   : > { %v809_v22 = vmul.f32 %v1560_v13, %v1552_v6  ;;  %v866_v23 = vpop.permute.xlu0 %865  ;;  %v962_v25 = vpop.permute.xlu1 %961 }
 0x3e6   : > { %v871_v24 = vsel %vm821_vm3, %v866_v23, 0  ;;  %v967_v29 = vsel %vm821_vm3, %v962_v25, 0  ;;  %v1548_v25 = vld [vmem:[%s1855_s10 + $0x18] sm:$0xff]  }
 0x3e7   : > { %1476 = vmatpush3.bf16.msra.mxu0 %v871_v24  ;;  %v813_v26 = vpack.c.bf16 %v809_v22, %v809_v22  ;;  %v1547_v24 = vld [vmem:[%s1855_s10 + $0x10] sm:$0xff]  }
 0x3e8   : > { %v1562_v27 = vpop.eup %1561  ;;  %1487 = vmatprep.subr.bf16.mxu0 %v1577_v1 }
 0x3e9   : > { %v810_v28 = vmul.f32 %v1562_v27, %v1554_v8 }
 0x3ea   : > { %1478 = vmatmul.mubr.msk.bf16.vlgmr.msra.gmra.mrb[12].mxu0 %vm577_vm2, %v813_v26  ;;  %v1393_v26 = vld [vmem:[%s1854_s9] ss:$0 sm:$0xff] }
 0x3eb   : > { %1488 = vmatpush3.bf16.msra.mxu0 %v967_v29  ;;  %v814_v30 = vpack.c.bf16 %v810_v28, %v810_v28  ;;  %1489 = vmatprep.mubr.msk.bf16.mxu0 %vm1578_vm0, %v1577_v1 }
 0x3ec   : > { %v1564_v31 = vpop.eup %1563  ;;  %1501 = vmatprep.subr.bf16.mxu0 %v1577_v1 }
 0x3ed   : > { %v811_v32 = vmul.f32 %v1564_v31, %v1556_v10  ;;  %1484 = vmatmul.mubr.msk.bf16.vlgmr.msra.gmra.mrb[12].mxu1 %vm577_vm2, %v814_v30 }
 0x3ee   : > { %1497 = vmatprep.mubr.msk.bf16.mxu1 %vm1578_vm0, %v1577_v1  ;;  %1494 = vmatpush3.bf16.msra.mxu1 %v1541_v38 }
 0x3ef   : > { %v815_v33 = vpack.c.bf16 %v811_v32, %v811_v32  ;;  %1495 = vmatprep.subr.bf16.mxu1 %v1577_v1 }
 0x3f2   : > { %1490 = vmatmul.mubr.msk.bf16.vlgmr.msra.gmra.mrb[16].mxu0 %vm577_vm2, %v815_v33  ;;  %1496 = vmatpush3.bf16.msra.mxu1 %v1542_v39 }
 0x3f3   : > { %1505 = vmatprep.mubr.msk.bf16.mxu0 %vm1578_vm0, %v1577_v1  ;;  %1509 = vmatprep.subr.bf16.mxu1 %v1577_v1 }
 0x3f4   : > { %1502 = vmatpush3.bf16.msra.mxu0 %v1543_v3 }
 0x3f5   : > { %1503 = vmatprep.subr.bf16.mxu0 %v1577_v1 }
 0x3f8   : > { %1504 = vmatpush3.bf16.msra.mxu0 %v1544_v11 }
 0x453   : > { %v859_v34 = vpop.f32.mrb[8].mxu1 }
 0x454   : > { %v1473_v35 = vpop.f32.mrb[9].mxu1 }
 0x455   : > { %v862_v36 = vpop.f32.mrb[10].mxu1 }
 0x456   : > { %v1474_v37 = vpop.f32.mrb[11].mxu1 }
 0x4bd   : > { %v907_v40 = vpop.f32.mrb[12].mxu0 }
 0x4be   : > { %1010 = vrot.lane.b32.xlu0 %v907_v40, %s1584_s24  ;;  %v1479_v41 = vpop.f32.mrb[13].mxu0 }
 0x4bf   : > { %v910_v42 = vpop.f32.mrb[14].mxu0 }
 0x4c0   : > { %v1480_v43 = vpop.f32.mrb[15].mxu0  ;;  %v955_v44 = vpop.f32.mrb[12].mxu1 }
 0x4c1   : > { %1014 = vrot.lane.b32.xlu1 %v955_v44, %s1585_s25  ;;  %v1485_v45 = vpop.f32.mrb[13].mxu1 }
 0x4c2   : > { %v958_v46 = vpop.f32.mrb[14].mxu1 }
 0x4c3   : > { %v1486_v47 = vpop.f32.mrb[15].mxu1 }
 0x4c5   : > { %v1003_v48 = vpop.f32.mrb[16].mxu0 }
 0x4c6   : > { %1018 = vrot.lane.b32.xlu0 %v1003_v48, %s1586_s26  ;;  %v1491_v49 = vpop.f32.mrb[17].mxu0 }
 0x4c7   : > { %v1006_v50 = vpop.f32.mrb[18].mxu0 }
 0x4c8   : > { %v1492_v51 = vpop.f32.mrb[19].mxu0  ;;  %v1403_v50 = vld [vmem:[%s1857_s12] ss:$0 sm:$0xff] }
 0x530   : > { %v1011_v52 = vpop.permute.xlu0 %1010 }
 0x531   : > { %v1021_v54 = vsel %vm577_vm2, %v859_v34, %v1011_v52  ;;  %v1404_v52 = vld [vmem:[%s1858_s13] ss:$0 sm:$0xff] }
 0x533   : > { %v1015_v53 = vpop.permute.xlu1 %1014 }
 0x534   : > { %v1023_v55 = vsel %vm1022_vm4, %v1021_v54, %v1015_v53 }
 0x538   : > { %v1019_v56 = vpop.permute.xlu0 %1018 }
 0x539   : > { %v1025_v57 = vsel %vm1024_vm5, %v1023_v55, %v1019_v56 }
 0x53a   : > { %v1026_v58 = vpack.c.bf16 %v1025_v57, %v1025_v57 }
 0x53c   : > { %1498 = vmatmul.mubr.msk.bf16.vlgmr.msra.gmra.mrb[16].mxu1 %vm502_vm1, %v1026_v58 }
 0x53d   : > { %1517 = vmatprep.mubr.msk.bf16.mxu1 %vm1578_vm0, %v1577_v1  ;;  %1510 = vmatpush3.bf16.msra.mxu1 %v1545_v14 }
 0x53e   : > { %1511 = vmatprep.subr.bf16.mxu1 %v1577_v1 }
 0x541   : > { %1512 = vmatpush3.bf16.msra.mxu1 %v1546_v15 }
 0x542   : > { %1513 = vmatprep.subr.bf16.mxu1 %v1577_v1 }
 0x545   : > { %1514 = vmatpush3.bf16.msra.mxu1 %v1547_v24 }
 0x546   : > { %1515 = vmatprep.subr.bf16.mxu1 %v1577_v1  ;;  %v1397_v1 = vld [vmem:[%s1856_s11] ss:$0 sm:$0xff] }
 0x549   : > { %1516 = vmatpush3.bf16.msra.mxu1 %v1548_v25 }
 0x60f   : > { %v1082_v61 = vpop.f32.mrb[16].mxu1 }
 0x610   : > { %v1083_v62 = vadd.f32 %v1387_v59, %v1082_v61  ;;  %v1499_v63 = vpop.f32.mrb[17].mxu1 }
 0x611   : > { %v1085_v0 = vpop.f32.mrb[18].mxu1 }
 0x612   : > { %v1500_v2 = vpop.f32.mrb[19].mxu1  ;;  %v1089_v4 = vadd.f32 %v1088_v60, %v1083_v62 }
 0x614   : > { %v1092_v5 = vsel %vm502_vm1, %v1089_v4, 0.0 }
 0x615   : > { %1093 = vadd.xlane.f32.xlu1 %v1092_v5 }
 0x6a2   : > { %v1094_v6 = vpop.xlane.xlu1 %1093 }
 0x6a3   : > { %v1096_v7 = vmul.f32 0.03125, %v1094_v6 }
 0x6a5   : > { %v1097_v8 = vsub.f32 %v1089_v4, %v1096_v7 }
 0x6a7   : > { %v1098_v9 = vmul.f32 %v1097_v8, %v1097_v8 }
 0x6a9   : > { %v1099_v10 = vsel %vm502_vm1, %v1098_v9, 0.0 }
 0x6aa   : > { %1100 = vadd.xlane.f32.xlu0 %v1099_v10 }
 0x737   : > { %v1101_v17 = vpop.xlane.xlu0 %1100 }
 0x738   : > { %v1102_v18 = vmul.f32 0.03125, %v1101_v17 }
 0x73a   : > { %v1103_v19 = vadd.f32 1e-05, %v1102_v18 }
 0x73c   : > { %1565 = vrsqrt.f32 %v1103_v19 }
 0x746   : > { %v1566_v20 = vpop.eup %1565 }
 0x747   : > { %v1105_v21 = vmul.f32 %v1566_v20, %v1097_v8 }
 0x749   : > { %v1112_v13 = vmul.f32 %v1391_v16, %v1105_v21 }
 0x74b   : > { %v1119_v22 = vadd.f32 %v1392_v12, %v1112_v13 }
 0x74d   : > { %v1120_v23 = vpack.c.bf16 %v1119_v22, %v1119_v22 }
 0x74f   : > { %1506 = vmatmul.mubr.msk.bf16.vlgmr.msra.gmra.mrb[20].mxu0 %vm502_vm1, %v1120_v23 }
 0x822   : > { %v1181_v27 = vpop.f32.mrb[20].mxu0 }
 0x823   : > { %v1182_v28 = vadd.f32 %v1393_v26, %v1181_v27  ;;  %v1507_v29 = vpop.f32.mrb[21].mxu0 }
 0x824   : > { %v1184_v30 = vpop.f32.mrb[22].mxu0 }
 0x825   : > { %v1187_v31 = vmax.f32 %v1182_v28, 0.0  ;;  %v1508_v32 = vpop.f32.mrb[23].mxu0 }
 0x827   : > { %v1188_v33 = vpack.c.bf16 %v1187_v31, %v1187_v31 }
 0x829   : > { %1518 = vmatmul.mubr.msk.bf16.vlgmr.msra.gmra.mrb[20].mxu1 %vm1228_vm6, %v1188_v33 }
 0x8fc   : > { %v1266_v34 = vpop.f32.mrb[20].mxu1 }
 0x8fd   : > { %v1267_v35 = vadd.f32 %v1397_v1, %v1266_v34  ;;  %v1519_v36 = vpop.f32.mrb[21].mxu1 }
 0x8fe   : > { %v1269_v37 = vpop.f32.mrb[22].mxu1 }
 0x8ff   : > { %v1520_v38 = vpop.f32.mrb[23].mxu1  ;;  %v1272_v39 = vadd.f32 %v1267_v35, %v1119_v22 }
 0x901   : > { %v1275_v40 = vsel %vm502_vm1, %v1272_v39, 0.0 }
 0x902   : > { %1276 = vadd.xlane.f32.xlu0 %v1275_v40 }
 0x98f   : > { %v1277_v41 = vpop.xlane.xlu0 %1276 }
 0x990   : > { %v1278_v42 = vmul.f32 0.03125, %v1277_v41 }
 0x992   : > { %v1279_v43 = vsub.f32 %v1272_v39, %v1278_v42 }
 0x994   : > { %v1280_v44 = vmul.f32 %v1279_v43, %v1279_v43 }
 0x996   : > { %v1281_v45 = vsel %vm502_vm1, %v1280_v44, 0.0 }
 0x997   : > { %1282 = vadd.xlane.f32.xlu1 %v1281_v45 }
 0xa24   : > { %v1283_v46 = vpop.xlane.xlu1 %1282 }
 0xa25   : > { %v1284_v47 = vmul.f32 0.03125, %v1283_v46 }
 0xa27   : > { %v1285_v48 = vadd.f32 1e-05, %v1284_v47 }
 0xa29   : > { %1567 = vrsqrt.f32 %v1285_v48 }
 0xa33   : > { %v1568_v49 = vpop.eup %1567 }
 0xa34   : > { %v1287_v51 = vmul.f32 %v1568_v49, %v1279_v43 }
 0xa36   : > { %v1294_v53 = vmul.f32 %v1403_v50, %v1287_v51 }
 0xa38   : > { %v1301_v54 = vadd.f32 %v1404_v52, %v1294_v53 }
 0xa3a   : > { %v1302_v55 = vpack.c.bf16 %v1301_v54, %v1301_v54 }
 0xa3c   : > { %1304 = vst.msk [vmem:[%s476_s15] sm:$0xf] %vm1303_vm7, %v1302_v55 }
 0xa3d PF: > { %s24_s29 = sadd.s32 1, %s1575_s29  }
 0xa3e   : > { %p21_p4 = scmp.ge.s32.totalorder %s24_s29, 4  }
 0xa40   :  { %23 = sbr.rel (!%p21_p4) target bundleno = 1 (0x1), region = 109 }

// kernel: transformer_forward.7
= control target key start
LH: loop header
LB: loop body
LE: loop exit
PB: predicated region body
PF: predicated region fallthrough
CT: control target
= control target key end

     0   :  { %s3069_s0 = inlined_call_operand.vmem [shape: bf16[2,8,32], index: 0, kind: input, shape index: {}]   ;;  %s3070_s1 = inlined_call_operand.vmem [shape: bf16[2,8,32], index: 1, kind: input, shape index: {}]   ;;  %s3071_s2 = inlined_call_operand.vmem [shape: f32[2,1,8], index: 2, kind: input, shape index: {}]   ;;  %s3072_s3 = inlined_call_operand.vmem [shape: bf16[32,96], index: 3, kind: input, shape index: {}]   ;;  %s3073_s4 = inlined_call_operand.vmem [shape: f32[1,96], index: 4, kind: input, shape index: {}]   ;;  %s3074_s5 = inlined_call_operand.vmem [shape: bf16[32,32], index: 5, kind: input, shape index: {}]   ;;  %s3075_s6 = inlined_call_operand.vmem [shape: f32[1,32], index: 6, kind: input, shape index: {}]   ;;  %s3076_s7 = inlined_call_operand.vmem [shape: f32[1,32], index: 7, kind: input, shape index: {}]   ;;  %s3077_s8 = inlined_call_operand.vmem [shape: f32[1,32], index: 8, kind: input, shape index: {}]   ;;  %s3078_s9 = inlined_call_operand.vmem [shape: bf16[32,96], index: 9, kind: input, shape index: {}]   ;;  %s3079_s10 = inlined_call_operand.vmem [shape: f32[1,96], index: 10, kind: input, shape index: {}]   ;;  %s3080_s11 = inlined_call_operand.vmem [shape: bf16[32,32], index: 11, kind: input, shape index: {}]   ;;  %s3081_s12 = inlined_call_operand.vmem [shape: f32[1,32], index: 12, kind: input, shape index: {}]   ;;  %s3082_s13 = inlined_call_operand.vmem [shape: f32[1,32], index: 13, kind: input, shape index: {}]   ;;  %s3083_s14 = inlined_call_operand.vmem [shape: f32[1,32], index: 14, kind: input, shape index: {}]   ;;  %s3084_s15 = inlined_call_operand.vmem [shape: bf16[32,64], index: 15, kind: input, shape index: {}]   ;;  %s3085_s16 = inlined_call_operand.vmem [shape: f32[1,64], index: 16, kind: input, shape index: {}]   ;;  %s3086_s17 = inlined_call_operand.vmem [shape: bf16[64,32], index: 17, kind: input, shape index: {}]   ;;  %s3087_s18 = inlined_call_operand.vmem [shape: f32[1,32], index: 18, kind: input, shape index: {}]   ;;  %s3088_s19 = inlined_call_operand.vmem [shape: f32[1,32], index: 19, kind: input, shape index: {}]   ;;  %s3089_s20 = inlined_call_operand.vmem [shape: f32[1,32], index: 20, kind: input, shape index: {}]   ;;  %s3090_s21 = inlined_call_operand.vmem [shape: bf16[2,8,32], index: 21, kind: output, shape index: {}]  }
   0x1   :  { %3100 = sst [smem:[#allocation2_spill]] %s3069_s0 }
   0x2   :  { %3101 = sst [smem:[#allocation3_spill]] %s3070_s1 }
   0x3   :  { %3102 = sst [smem:[#allocation4_spill]] %s3071_s2  ;;  %s2735_s2 = smov 0  }
   0x4   :  { %3103 = sst [smem:[#allocation5_spill]] %s3072_s3 }
   0x5   :  { %3104 = sst [smem:[#allocation6_spill]] %s3073_s4 }
   0x6   :  { %3105 = sst [smem:[#allocation7_spill]] %s3074_s5 }
   0x7 LB: > { %s2264_s25 = sadd.s32 4294967295, %s2612_s2   ;;  %p2268_p0 = scmp.ge.s32.totalorder %s2612_s2, 1  ;;  %s2612_s2 = sphi %s2735_s2, %s31_s2  }
   0x8   : > { %p603_p1 = scmp.lt.s32.totalorder %s2612_s2, 3 }
   0xa   : > { %p604_p2 = pnand %p2268_p0, %p603_p1 }
   0xb   : > { %s3106_s3 = sld [smem:[#allocation5_spill]] (!%p604_p2)  ;;  %v2614_v1 = vmov (!%p604_p2), 0.0   ;;  %vm2615_vm0 = vmmov (!%p604_p2), 0   ;;  %p668_p3 = scmp.lt.s32.totalorder (!%p604_p2), %s2264_s25, 1  ;;  %vm715_vm1 = vcmask (!%p604_p2), 261120   ;;  %vm783_vm2 = vcmask (!%p604_p2), 64512  }
   0xc   : > { %607 = sbr.rel (%p604_p2) target bundleno = 4362 (0x110a), region = 104  ;;  %2379 = vmatprep.subr.bf16.mxu1 (!%p604_p2), %v2614_v1  ;;  %2393 = vmatprep.subr.bf16.mxu0 (!%p604_p2), %v2614_v1  ;;  %s3107_s5 = sld [smem:[#allocation2_spill]] (!%p604_p2)  ;;  %v686_v27 = vlaneseq (!%p604_p2)  ;;  %v2620_v30 = vmov (!%p604_p2), -1e+20   ;;  %vm1027_vm4 = vcmask (!%p604_p2), 1043456   ;;  %vm1228_vm5 = vcmask (!%p604_p2), 130048  }
   0xd   : > { %2383 = vmatprep.mubr.msk.bf16.mxu1 (!%p604_p2), %vm2615_vm0, %v2614_v1  ;;  %2395 = vmatprep.mubr.msk.bf16.mxu0 (!%p604_p2), %vm2615_vm0, %v2614_v1  ;;  %s3108_s24 = sld [smem:[#allocation6_spill]] (!%p604_p2)  ;;  %s3098_s26 = smov (!%p604_p2), 104   ;;  %vm1230_vm6 = vcmask (!%p604_p2), 195584   ;;  %vm2113_vm7 = vcmask (!%p604_p2), 523264   ;;  %vm2188_vm8 = vcmask (!%p604_p2), 257024  }
   0xe   : > { %s2617_s27 = smov (!%p604_p2), 120   ;;  %s3096_s28 = smov (!%p604_p2), 96   ;;  %v687_v28 = vshrl.u32 (!%p604_p2), %v686_v27, 7  ;;  %v689_v29 = vand.u32 (!%p604_p2), 127, %v686_v27 }
   0xf   : > { %s2619_s29 = smov (!%p604_p2), 112   ;;  %s2621_s4 = smov (!%p604_p2), 64  }
  0x10   : > { %vm690_vm3 = vcmp.le.s32.totalorder (!%p604_p2), %v689_v29, %v687_v28  ;;  %s3093_s30 = smov (!%p604_p2), 24   ;;  %s3114_s1 = smov (!%p604_p2), 8  }
  0x11   : > { %v2554_v0 = vld [vmem:[%s3106_s3] sm:$0xff] (!%p604_p2)   ;;  %v2555_v2 = vld [vmem:[%s3106_s3 + $0x8] sm:$0xff] (!%p604_p2)   ;;  %v691_v31 = vsel (!%p604_p2), %vm690_vm3, 0.0, %v2620_v30 }
  0x12   : > { %2380 = vmatpush3.bf16.msra.mxu1 (!%p604_p2), %v2554_v0 }
  0x13   : > { %2381 = vmatprep.subr.bf16.mxu1 %v2614_v1  ;;  %s3118_s25 = smov (!%p668_p3, %s2264_s25), 1  ;;  %v2272_v4 = vld [vmem:[%s3108_s24] ss:$0 sm:$0xff]  ;;  %s3095_s24 = smov 8  }
  0x14   : > { %s2759_s0 = sshll.u32 %s3118_s25, 2 }
  0x15   : > { %s671_s22 = scalar_lea.vmem %s3107_s5, %s2759_s0  ;;  %s682_s23 = scalar_lea.vmem %s3090_s21, %s2759_s0 }
  0x16   : > { %2382 = vmatpush3.bf16.msra.mxu1 %v2555_v2  ;;  %v2766_v3 = vld [vmem:[%s671_s22] sm:$0xf]  ;;  %s3109_s22 = sld [smem:[#allocation7_spill]] }
  0x17   : > { %2387 = vmatprep.subr.bf16.mxu1 %v2614_v1 }
  0x19   : > { %2384 = vmatmul.mubr.msk.bf16.vlgmr.msra.gmra.mrb[0].mxu1 %vm715_vm1, %v2766_v3 }
  0x1a   : > { %2389 = vmatprep.mubr.msk.bf16.mxu1 %vm2615_vm0, %v2614_v1 }
  0xec   : > { %v753_v5 = vpop.f32.mrb[0].mxu1 }
  0xed   : > { %v754_v6 = vadd.f32 %v2272_v4, %v753_v5  ;;  %v2385_v7 = vpop.f32.mrb[1].mxu1 }
  0xee   : > { %v756_v8 = vpop.f32.mrb[2].mxu1 }
  0xef   : > { %v2775_v9 = vpack.c.bf16 %v754_v6, %v754_v6  ;;  %v2386_v10 = vpop.f32.mrb[3].mxu1  ;;  %v759_v11 = vmul.f32 0.17677669, %v754_v6 }
  0xf1   : > { %779 = vrot.lane.b32.xlu1 %v2775_v9, %s3098_s26  ;;  %775 = vrot.lane.b32.xlu0 %v2775_v9, %s2617_s27  ;;  %v765_v14 = vpack.c.bf16 %v759_v11, %v759_v11 }
  0xf5   : > { %781 = vrot.lane.b32.xlu1 %v2775_v9, %s3096_s28  ;;  %777 = vrot.lane.b32.xlu0 %v2775_v9, %s2619_s29 }
 0x163   : > { %v2785_v12 = vpop.permute.xlu1 %779  ;;  %v2787_v13 = vpop.permute.xlu0 %775 }
 0x164   : > { %830 = vrot.lane.b32.xlu0 %v2787_v13, %s3096_s28 }
 0x167   : > { %v782_v15 = vpop.permute.xlu1 %781  ;;  %v2791_v16 = vpop.permute.xlu0 %777 }
 0x168   : > { %v788_v17 = vsel %vm783_vm2, %v782_v15, 0  ;;  %878 = vrot.lane.b32.xlu1 %v2791_v16, %s3096_s28  ;;  %768 = vrot.lane.b32.xlu0 %v765_v14, %s2617_s27 }
 0x169   : > { %2388 = vmatpush3.bf16.xpose.msra.mxu1 %v788_v17 }
 0x16a   : > { %2399 = vmatprep.subr.bf16.mxu1 %v2614_v1 }
 0x16c   : > { %926 = vrot.lane.b32.xlu1 %v2785_v12, %s3096_s28  ;;  %770 = vrot.lane.b32.xlu0 %v765_v14, %s2619_s29 }
 0x170   : > { %772 = vrot.lane.b32.xlu1 %v765_v14, %s3098_s26  ;;  %2390 = vmatmul.mubr.msk.bf16.vlgmr.msra.gmra.mrb[4].mxu1 %vm783_vm2, %v765_v14  ;;  %s3111_s26 = smov 104  }
 0x171   : > { %2401 = vmatprep.mubr.msk.bf16.mxu1 %vm2615_vm0, %v2614_v1 }
 0x1d6   : > { %v831_v18 = vpop.permute.xlu0 %830 }
 0x1d7   : > { %v836_v19 = vsel %vm783_vm2, %v831_v18, 0 }
 0x1d8   : > { %2394 = vmatpush3.bf16.xpose.msra.mxu0 %v836_v19 }
 0x1d9   : > { %2405 = vmatprep.subr.bf16.mxu0 %v2614_v1 }
 0x1da   : > { %v879_v20 = vpop.permute.xlu1 %878  ;;  %v769_v22 = vpop.permute.xlu0 %768 }
 0x1db   : > { %v884_v21 = vsel %vm783_vm2, %v879_v20, 0 }
 0x1dc   : > { %2400 = vmatpush3.bf16.xpose.msra.mxu1 %v884_v21 }
 0x1dd   : > { %2411 = vmatprep.subr.bf16.mxu1 %v2614_v1 }
 0x1de   : > { %v927_v23 = vpop.permute.xlu1 %926  ;;  %v771_v25 = vpop.permute.xlu0 %770 }
 0x1df   : > { %v932_v24 = vsel %vm783_vm2, %v927_v23, 0  ;;  %2396 = vmatmul.mubr.msk.bf16.vlgmr.msra.gmra.mrb[0].mxu0 %vm783_vm2, %v769_v22 }
 0x1e0   : > { %2406 = vmatpush3.bf16.xpose.msra.mxu0 %v932_v24  ;;  %2407 = vmatprep.mubr.msk.bf16.mxu0 %vm2615_vm0, %v2614_v1 }
 0x1e1   : > { %2417 = vmatprep.subr.bf16.mxu0 %v2614_v1 }
 0x1e2   : > { %v773_v26 = vpop.permute.xlu1 %772 }
 0x1e3   : > { %2402 = vmatmul.mubr.msk.bf16.vlgmr.msra.gmra.mrb[8].mxu1 %vm783_vm2, %v771_v25 }
 0x1e4   : > { %2413 = vmatprep.mubr.msk.bf16.mxu1 %vm2615_vm0, %v2614_v1 }
 0x1e7   : > { %2408 = vmatmul.mubr.msk.bf16.vlgmr.msra.gmra.mrb[4].mxu0 %vm783_vm2, %v773_v26 }
 0x1e8   : > { %2419 = vmatprep.mubr.msk.bf16.mxu0 %vm2615_vm0, %v2614_v1 }
 0x243   : > { %v824_v32 = vpop.f32.mrb[4].mxu1 }
 0x244   : > { %v825_v33 = vadd.f32 %v824_v32, %v691_v31  ;;  %v2391_v34 = vpop.f32.mrb[5].mxu1 }
 0x245   : > { %v827_v35 = vpop.f32.mrb[6].mxu1 }
 0x246   : > { %v2392_v36 = vpop.f32.mrb[7].mxu1  ;;  %v974_v37 = vsel %vm783_vm2, %v825_v33, -inf }
 0x247   : > { %975 = vmax.xlane.f32.xlu0 %v974_v37 }
 0x2b2   : > { %v872_v38 = vpop.f32.mrb[0].mxu0 }
 0x2b3   : > { %v873_v39 = vadd.f32 %v872_v38, %v691_v31  ;;  %v2397_v40 = vpop.f32.mrb[1].mxu0 }
 0x2b4   : > { %v875_v41 = vpop.f32.mrb[2].mxu0 }
 0x2b5   : > { %v2398_v42 = vpop.f32.mrb[3].mxu0  ;;  %v977_v43 = vsel %vm783_vm2, %v873_v39, -inf }
 0x2b6   : > { %978 = vmax.xlane.f32.xlu1 %v977_v43  ;;  %v920_v44 = vpop.f32.mrb[8].mxu1  ;;  %v2556_v42 = vld [vmem:[%s3109_s22] sm:$0xff]   ;;  %v2557_v43 = vld [vmem:[%s3109_s22 + $0x8] sm:$0xff]  }
 0x2b7   : > { %v921_v45 = vadd.f32 %v920_v44, %v691_v31  ;;  %v2403_v46 = vpop.f32.mrb[9].mxu1 }
 0x2b8   : > { %v923_v47 = vpop.f32.mrb[10].mxu1 }
 0x2b9   : > { %v2404_v48 = vpop.f32.mrb[11].mxu1  ;;  %v980_v49 = vsel %vm783_vm2, %v921_v45, -inf }
 0x2ba   : > { %v968_v50 = vpop.f32.mrb[4].mxu0  ;;  %981 = vmax.xlane.f32.xlu0 %v980_v49 }
 0x2bb   : > { %v969_v51 = vadd.f32 %v968_v50, %v691_v31  ;;  %v2409_v52 = vpop.f32.mrb[5].mxu0 }
 0x2bc   : > { %v971_v53 = vpop.f32.mrb[6].mxu0 }
 0x2bd   : > { %v2410_v54 = vpop.f32.mrb[7].mxu0  ;;  %v983_v55 = vsel %vm783_vm2, %v969_v51, -inf }
 0x2be   : > { %984 = vmax.xlane.f32.xlu0 %v983_v55 }
 0x2c7   : > { %1022 = vrot.lane.b32.xlu1 %v2775_v9, %s2621_s4 }
 0x2d4   : > { %v976_v56 = vpop.xlane.xlu0 %975 }
 0x2d5   : > { %v986_v57 = vsub.f32 %v825_v33, %v976_v56 }
 0x2d7   : > { %v990_v58 = vmul.f32 1.442695, %v986_v57 }
 0x2d9   : > { %2568 = vpow2.f32 %v990_v58 }
 0x2e3   : > { %v2569_v59 = vpop.eup %2568 }
 0x2e4   : > { %v998_v60 = vsel %vm783_vm2, %v2569_v59, 0.0 }
 0x2eb   : > { %999 = vadd.xlane.f32.xlu1 %v998_v60 }
 0x343   : > { %v979_v61 = vpop.xlane.xlu1 %978 }
 0x344   : > { %v987_v62 = vsub.f32 %v873_v39, %v979_v61 }
 0x346   : > { %v992_v63 = vmul.f32 1.442695, %v987_v62 }
 0x347   : > { %v1023_v0 = vpop.permute.xlu1 %1022  ;;  %v982_v2 = vpop.xlane.xlu0 %981 }
 0x348   : > { %2570 = vpow2.f32 %v992_v63  ;;  %v1029_v4 = vsel %vm1027_vm4, %v1023_v0, 0  ;;  %v988_v5 = vsub.f32 %v921_v45, %v982_v2  ;;  %v2284_v63 = vld [vmem:[%s3075_s6] ss:$0 sm:$0xff]  ;;  %v1294_v0 = vunpack.c.l.bf16 %v2766_v3  ;;  %v2559_v3 = vld [vmem:[%s3078_s9 + $0x8] sm:$0xff]  }
 0x349   : > { %2412 = vmatpush3.bf16.msra.mxu1 %v1029_v4 }
 0x34a   : > { %v994_v6 = vmul.f32 1.442695, %v988_v5  ;;  %2423 = vmatprep.subr.bf16.mxu1 %v2614_v1 }
 0x34b   : > { %v985_v7 = vpop.xlane.xlu0 %984 }
 0x34c   : > { %2572 = vpow2.f32 %v994_v6  ;;  %v989_v8 = vsub.f32 %v969_v51, %v985_v7 }
 0x34e   : > { %v996_v9 = vmul.f32 1.442695, %v989_v8 }
 0x350   : > { %2574 = vpow2.f32 %v996_v9 }
 0x352   : > { %v2571_v10 = vpop.eup %2570 }
 0x353   : > { %v1001_v11 = vsel %vm783_vm2, %v2571_v10, 0.0 }
 0x354   : > { %1002 = vadd.xlane.f32.xlu0 %v1001_v11 }
 0x356   : > { %v2573_v14 = vpop.eup %2572 }
 0x357   : > { %v1004_v15 = vsel %vm783_vm2, %v2573_v14, 0.0 }
 0x358   : > { %1005 = vadd.xlane.f32.xlu1 %v1004_v15 }
 0x35a   : > { %v2575_v17 = vpop.eup %2574 }
 0x35b   : > { %v1007_v18 = vsel %vm783_vm2, %v2575_v17, 0.0 }
 0x35c   : > { %1008 = vadd.xlane.f32.xlu0 %v1007_v18 }
 0x369   : > { %1119 = vrot.lane.b32.xlu1 %v2791_v16, %s2621_s4 }
 0x36d   : > { %1167 = vrot.lane.b32.xlu1 %v2785_v12, %s2621_s4 }
 0x372   : > { %1071 = vrot.lane.b32.xlu0 %v2787_v13, %s2621_s4  ;;  %s3094_s4 = smov 16  }
 0x378   : > { %v1000_v19 = vpop.xlane.xlu1 %999 }
 0x379   : > { %2576 = vrcp.f32 %v1000_v19  ;;  %v2290_v19 = vld [vmem:[%s3079_s10] ss:$0 sm:$0xff] }
 0x383   : > { %v2577_v20 = vpop.eup %2576 }
 0x384   : > { %v1014_v21 = vmul.f32 %v2577_v20, %v2569_v59 }
 0x386   : > { %v1018_v22 = vpack.c.bf16 %v1014_v21, %v1014_v21 }
 0x388   : > { %2414 = vmatmul.mubr.msk.bf16.vlgmr.msra.gmra.mrb[12].mxu1 %vm783_vm2, %v1018_v22 }
 0x389   : > { %2425 = vmatprep.mubr.msk.bf16.mxu1 %vm2615_vm0, %v2614_v1 }
 0x3e1   : > { %v1003_v23 = vpop.xlane.xlu0 %1002 }
 0x3e2   : > { %2578 = vrcp.f32 %v1003_v23 }
 0x3e5   : > { %v1006_v24 = vpop.xlane.xlu1 %1005 }
 0x3e6   : > { %2580 = vrcp.f32 %v1006_v24 }
 0x3e9   : > { %v1120_v16 = vpop.permute.xlu1 %1119  ;;  %v1009_v25 = vpop.xlane.xlu0 %1008 }
 0x3ea   : > { %v1125_v12 = vsel %vm1027_vm4, %v1120_v16, 0  ;;  %2582 = vrcp.f32 %v1009_v25 }
 0x3eb   : > { %2424 = vmatpush3.bf16.msra.mxu1 %v1125_v12  ;;  %v2288_v12 = vld [vmem:[%s3076_s7] ss:$0 sm:$0xff] }
 0x3ec   : > { %v2579_v13 = vpop.eup %2578  ;;  %2435 = vmatprep.subr.bf16.mxu1 %v2614_v1 }
 0x3ed   : > { %v1015_v26 = vmul.f32 %v2579_v13, %v2571_v10  ;;  %v1072_v27 = vpop.permute.xlu0 %1071  ;;  %v1168_v29 = vpop.permute.xlu1 %1167  ;;  %v2558_v10 = vld [vmem:[%s3078_s9] sm:$0xff]  }
 0x3ee   : > { %v1077_v28 = vsel %vm1027_vm4, %v1072_v27, 0  ;;  %v1173_v33 = vsel %vm1027_vm4, %v1168_v29, 0 }
 0x3ef   : > { %2418 = vmatpush3.bf16.msra.mxu0 %v1077_v28  ;;  %v1019_v30 = vpack.c.bf16 %v1015_v26, %v1015_v26  ;;  %v2289_v26 = vld [vmem:[%s3077_s8] ss:$0 sm:$0xff] }
 0x3f0   : > { %v2581_v31 = vpop.eup %2580  ;;  %2429 = vmatprep.subr.bf16.mxu0 %v2614_v1 }
 0x3f1   : > { %v1016_v32 = vmul.f32 %v2581_v31, %v2573_v14 }
 0x3f2   : > { %2420 = vmatmul.mubr.msk.bf16.vlgmr.msra.gmra.mrb[8].mxu0 %vm783_vm2, %v1019_v30 }
 0x3f3   : > { %2430 = vmatpush3.bf16.msra.mxu0 %v1173_v33  ;;  %v1020_v34 = vpack.c.bf16 %v1016_v32, %v1016_v32  ;;  %2431 = vmatprep.mubr.msk.bf16.mxu0 %vm2615_vm0, %v2614_v1 }
 0x3f4   : > { %v2583_v35 = vpop.eup %2582  ;;  %2443 = vmatprep.subr.bf16.mxu0 %v2614_v1 }
 0x3f5   : > { %v1017_v36 = vmul.f32 %v2583_v35, %v2575_v17  ;;  %2426 = vmatmul.mubr.msk.bf16.vlgmr.msra.gmra.mrb[16].mxu1 %vm783_vm2, %v1020_v34 }
 0x3f6   : > { %2439 = vmatprep.mubr.msk.bf16.mxu1 %vm2615_vm0, %v2614_v1  ;;  %2436 = vmatpush3.bf16.msra.mxu1 %v2556_v42 }
 0x3f7   : > { %v1021_v37 = vpack.c.bf16 %v1017_v36, %v1017_v36  ;;  %2437 = vmatprep.subr.bf16.mxu1 %v2614_v1 }
 0x3fa   : > { %2432 = vmatmul.mubr.msk.bf16.vlgmr.msra.gmra.mrb[12].mxu0 %vm783_vm2, %v1021_v37  ;;  %2438 = vmatpush3.bf16.msra.mxu1 %v2557_v43 }
 0x3fb   : > { %2447 = vmatprep.mubr.msk.bf16.mxu0 %vm2615_vm0, %v2614_v1  ;;  %2451 = vmatprep.subr.bf16.mxu1 %v2614_v1 }
 0x3fc   : > { %2444 = vmatpush3.bf16.msra.mxu0 %v2558_v10 }
 0x3fd   : > { %2445 = vmatprep.subr.bf16.mxu0 %v2614_v1 }
 0x400   : > { %2446 = vmatpush3.bf16.msra.mxu0 %v2559_v3 }
 0x401   : > { %2459 = vmatprep.subr.bf16.mxu0 %v2614_v1 }
 0x45b   : > { %v1065_v38 = vpop.f32.mrb[12].mxu1 }
 0x45c   : > { %v2415_v39 = vpop.f32.mrb[13].mxu1 }
 0x45d   : > { %v1068_v40 = vpop.f32.mrb[14].mxu1 }
 0x45e   : > { %v2416_v41 = vpop.f32.mrb[15].mxu1 }
 0x4c5   : > { %v1113_v44 = vpop.f32.mrb[8].mxu0 }
 0x4c6   : > { %1216 = vrot.lane.b32.xlu0 %v1113_v44, %s3095_s24  ;;  %v2421_v45 = vpop.f32.mrb[9].mxu0 }
 0x4c7   : > { %v1116_v46 = vpop.f32.mrb[10].mxu0 }
 0x4c8   : > { %v2422_v47 = vpop.f32.mrb[11].mxu0  ;;  %v1161_v48 = vpop.f32.mrb[16].mxu1 }
 0x4c9   : > { %1220 = vrot.lane.b32.xlu1 %v1161_v48, %s3094_s4  ;;  %v2427_v49 = vpop.f32.mrb[17].mxu1  ;;  %s3110_s4 = sld [smem:[#allocation3_spill]] }
 0x4ca   : > { %v1164_v50 = vpop.f32.mrb[18].mxu1 }
 0x4cb   : > { %v2428_v51 = vpop.f32.mrb[19].mxu1 }
 0x4cd   : > { %v1209_v52 = vpop.f32.mrb[12].mxu0 }
 0x4ce   : > { %1224 = vrot.lane.b32.xlu0 %v1209_v52, %s3093_s30  ;;  %v2433_v53 = vpop.f32.mrb[13].mxu0 }
 0x4cf   : > { %v1212_v54 = vpop.f32.mrb[14].mxu0  ;;  %s675_s24 = scalar_lea.vmem %s3110_s4, %s2759_s0 }
 0x4d0   : > { %v2434_v55 = vpop.f32.mrb[15].mxu0  ;;  %v685_v16 = vld [vmem:[%s675_s24] sm:$0xf] }
 0x538   : > { %v1217_v56 = vpop.permute.xlu0 %1216 }
 0x539   : > { %v1227_v58 = vsel %vm783_vm2, %v1065_v38, %v1217_v56 }
 0x53b   : > { %v1221_v57 = vpop.permute.xlu1 %1220 }
 0x53c   : > { %v1229_v59 = vsel %vm1228_vm5, %v1227_v58, %v1221_v57 }
 0x540   : > { %v1225_v60 = vpop.permute.xlu0 %1224 }
 0x541   : > { %v1231_v61 = vsel %vm1230_vm6, %v1229_v59, %v1225_v60 }
 0x542   : > { %v1232_v62 = vpack.c.bf16 %v1231_v61, %v1231_v61 }
 0x544   : > { %2440 = vmatmul.mubr.msk.bf16.vlgmr.msra.gmra.mrb[20].mxu1 %vm715_vm1, %v1232_v62 }
 0x545   : > { %2455 = vmatprep.mubr.msk.bf16.mxu1 %vm2615_vm0, %v2614_v1 }
 0x617   : > { %v1288_v2 = vpop.f32.mrb[20].mxu1 }
 0x618   : > { %v1289_v4 = vadd.f32 %v2284_v63, %v1288_v2  ;;  %v2441_v5 = vpop.f32.mrb[21].mxu1 }
 0x619   : > { %v1291_v6 = vpop.f32.mrb[22].mxu1 }
 0x61a   : > { %v2442_v7 = vpop.f32.mrb[23].mxu1  ;;  %v1295_v8 = vadd.f32 %v1294_v0, %v1289_v4 }
 0x61c   : > { %v1298_v9 = vsel %vm715_vm1, %v1295_v8, 0.0 }
 0x61d   : > { %1299 = vadd.xlane.f32.xlu1 %v1298_v9 }
 0x62e   : > { %1396 = vrot.lane.b32.xlu1 %v2559_v3, %s3096_s28 }
 0x632   : > { %1400 = vrot.lane.b32.xlu1 %v2290_v19, %s3096_s28 }
 0x6aa   : > { %v1300_v11 = vpop.xlane.xlu1 %1299 }
 0x6ab   : > { %v1302_v14 = vmul.f32 0.03125, %v1300_v11 }
 0x6ad   : > { %v1303_v15 = vsub.f32 %v1295_v8, %v1302_v14 }
 0x6ae   : > { %v1397_v24 = vpop.permute.xlu1 %1396 }
 0x6af   : > { %v1304_v17 = vmul.f32 %v1303_v15, %v1303_v15 }
 0x6b1   : > { %v1305_v18 = vsel %vm715_vm1, %v1304_v17, 0.0 }
 0x6b2   : > { %1306 = vadd.xlane.f32.xlu0 %v1305_v18  ;;  %v1401_v30 = vpop.permute.xlu1 %1400 }
 0x6c8   : > { %1394 = vrot.lane.b32.xlu0 %v2558_v10, %s3096_s28 }
 0x73f   : > { %v1307_v20 = vpop.xlane.xlu0 %1306 }
 0x740   : > { %v1308_v21 = vmul.f32 0.03125, %v1307_v20 }
 0x742   : > { %v1309_v22 = vadd.f32 1e-05, %v1308_v21 }
 0x743   : > { %v1395_v23 = vpop.permute.xlu0 %1394 }
 0x744   : > { %2584 = vrsqrt.f32 %v1309_v22  ;;  %2452 = vmatpush3.bf16.msra.mxu1 %v1395_v23 }
 0x745   : > { %2453 = vmatprep.subr.bf16.mxu1 %v2614_v1 }
 0x748   : > { %2454 = vmatpush3.bf16.msra.mxu1 %v1397_v24 }
 0x749   : > { %2465 = vmatprep.subr.bf16.mxu1 %v2614_v1 }
 0x74b   : > { %2456 = vmatmul.mubr.msk.bf16.vlgmr.msra.gmra.mrb[24].mxu1 %vm715_vm1, %v685_v16 }
 0x74c   : > { %2467 = vmatprep.mubr.msk.bf16.mxu1 %vm2615_vm0, %v2614_v1 }
 0x74e   : > { %v2585_v25 = vpop.eup %2584 }
 0x74f   : > { %v1311_v13 = vmul.f32 %v2585_v25, %v1303_v15 }
 0x751   : > { %v1318_v27 = vmul.f32 %v2288_v12, %v1311_v13 }
 0x753   : > { %v2908_v28 = vadd.f32 %v2289_v26, %v1318_v27 }
 0x755   : > { %v1331_v29 = vpack.c.bf16 %v2908_v28, %v2908_v28 }
 0x757   : > { %2448 = vmatmul.mubr.msk.bf16.vlgmr.msra.gmra.mrb[16].mxu0 %vm715_vm1, %v1331_v29 }
 0x758   : > { %2461 = vmatprep.mubr.msk.bf16.mxu0 %vm2615_vm0, %v2614_v1 }
 0x81e   : > { %v1440_v31 = vpop.f32.mrb[24].mxu1 }
 0x81f   : > { %v1441_v32 = vadd.f32 %v1440_v31, %v1401_v30  ;;  %v2457_v33 = vpop.f32.mrb[25].mxu1 }
 0x820   : > { %v1443_v34 = vpop.f32.mrb[26].mxu1 }
 0x821   : > { %v2915_v35 = vpack.c.bf16 %v1441_v32, %v1441_v32  ;;  %v2458_v36 = vpop.f32.mrb[27].mxu1 }
 0x823   : > { %1464 = vrot.lane.b32.xlu1 %v2915_v35, %s2619_s29  ;;  %1462 = vrot.lane.b32.xlu0 %v2915_v35, %s2617_s27  ;;  %v1478_v37 = vsel %vm783_vm2, %v2915_v35, 0 }
 0x824   : > { %2460 = vmatpush3.bf16.xpose.msra.mxu0 %v1478_v37 }
 0x825   : > { %2471 = vmatprep.subr.bf16.mxu0 %v2614_v1 }
 0x827   : > { %1466 = vrot.lane.b32.xlu1 %v2915_v35, %s3111_s26 }
 0x82a   : > { %v1387_v38 = vpop.f32.mrb[16].mxu0 }
 0x82b   : > { %v1388_v39 = vadd.f32 %v2290_v19, %v1387_v38  ;;  %v2449_v40 = vpop.f32.mrb[17].mxu0 }
 0x82c   : > { %v1390_v41 = vpop.f32.mrb[18].mxu0 }
 0x82d   : > { %v1393_v42 = vmul.f32 0.17677669, %v1388_v39  ;;  %v2450_v43 = vpop.f32.mrb[19].mxu0 }
 0x82f   : > { %v1452_v44 = vpack.c.bf16 %v1393_v42, %v1393_v42 }
 0x831   : > { %1459 = vrot.lane.b32.xlu1 %v1452_v44, %s3111_s26  ;;  %1455 = vrot.lane.b32.xlu0 %v1452_v44, %s2617_s27  ;;  %s3115_s26 = smov 16   ;;  %s3116_s27 = smov 24  }
 0x832   : > { %2462 = vmatmul.mubr.msk.bf16.vlgmr.msra.gmra.mrb[20].mxu0 %vm783_vm2, %v1452_v44 }
 0x833   : > { %2473 = vmatprep.mubr.msk.bf16.mxu0 %vm2615_vm0, %v2614_v1 }
 0x835   : > { %1457 = vrot.lane.b32.xlu0 %v1452_v44, %s2619_s29  ;;  %s3112_s29 = sld [smem:[#allocation4_spill]] }
 0x83b   : > { %s678_s24 = scalar_lea.vmem %s3112_s29, %s3118_s25  ;;  %s3113_s25 = smov 96  }
 0x83c   : > { %v2295_v54 = vld [vmem:[%s678_s24] ss:$0 sm:$0xff] }
 0x895   : > { %v2932_v45 = vpop.permute.xlu1 %1464  ;;  %v2934_v46 = vpop.permute.xlu0 %1462 }
 0x896   : > { %v1570_v47 = vsel %vm783_vm2, %v2932_v45, 0  ;;  %v1524_v48 = vsel %vm783_vm2, %v2934_v46, 0 }
 0x897   : > { %2466 = vmatpush3.bf16.xpose.msra.mxu1 %v1524_v48  ;;  %2472 = vmatpush3.bf16.xpose.msra.mxu0 %v1570_v47 }
 0x898   : > { %2477 = vmatprep.subr.bf16.mxu1 %v2614_v1  ;;  %2483 = vmatprep.subr.bf16.mxu0 %v2614_v1 }
 0x899   : > { %v2942_v49 = vpop.permute.xlu1 %1466 }
 0x89a   : > { %v1616_v51 = vsel %vm783_vm2, %v2942_v49, 0 }
 0x8a3   : > { %v1456_v50 = vpop.permute.xlu0 %1455  ;;  %v1460_v53 = vpop.permute.xlu1 %1459 }
 0x8a4   : > { %2468 = vmatmul.mubr.msk.bf16.vlgmr.msra.gmra.mrb[28].mxu1 %vm783_vm2, %v1456_v50 }
 0x8a5   : > { %2478 = vmatpush3.bf16.xpose.msra.mxu1 %v1616_v51  ;;  %2479 = vmatprep.mubr.msk.bf16.mxu1 %vm2615_vm0, %v2614_v1 }
 0x8a6   : > { %2489 = vmatprep.subr.bf16.mxu1 %v2614_v1 }
 0x8a7   : > { %v1458_v52 = vpop.permute.xlu0 %1457 }
 0x8a8   : > { %2474 = vmatmul.mubr.msk.bf16.vlgmr.msra.gmra.mrb[24].mxu0 %vm783_vm2, %v1458_v52 }
 0x8a9   : > { %2485 = vmatprep.mubr.msk.bf16.mxu0 %vm2615_vm0, %v2614_v1 }
 0x8ac   : > { %2480 = vmatmul.mubr.msk.bf16.vlgmr.msra.gmra.mrb[32].mxu1 %vm783_vm2, %v1460_v53 }
 0x8ad   : > { %2491 = vmatprep.mubr.msk.bf16.mxu1 %vm2615_vm0, %v2614_v1 }
 0x905   : > { %v1514_v55 = vpop.f32.mrb[20].mxu0 }
 0x906   : > { %v1515_v56 = vadd.f32 %v2295_v54, %v1514_v55  ;;  %v2463_v57 = vpop.f32.mrb[21].mxu0 }
 0x907   : > { %v1517_v58 = vpop.f32.mrb[22].mxu0 }
 0x908   : > { %v2464_v59 = vpop.f32.mrb[23].mxu0  ;;  %v1658_v60 = vsel %vm783_vm2, %v1515_v56, -inf }
 0x909   : > { %1659 = vmax.xlane.f32.xlu0 %v1658_v60 }
 0x977   : > { %v1560_v61 = vpop.f32.mrb[28].mxu1 }
 0x978   : > { %v1561_v62 = vadd.f32 %v2295_v54, %v1560_v61  ;;  %v2469_v63 = vpop.f32.mrb[29].mxu1 }
 0x979   : > { %v1563_v0 = vpop.f32.mrb[30].mxu1 }
 0x97a   : > { %v2470_v2 = vpop.f32.mrb[31].mxu1  ;;  %v1661_v4 = vsel %vm783_vm2, %v1561_v62, -inf }
 0x97b   : > { %v1606_v5 = vpop.f32.mrb[24].mxu0  ;;  %1662 = vmax.xlane.f32.xlu1 %v1661_v4  ;;  %v2560_v2 = vld [vmem:[%s3080_s11] sm:$0xff]   ;;  %v2561_v4 = vld [vmem:[%s3080_s11 + $0x8] sm:$0xff]  }
 0x97c   : > { %v1607_v6 = vadd.f32 %v2295_v54, %v1606_v5  ;;  %v2475_v7 = vpop.f32.mrb[25].mxu0 }
 0x97d   : > { %v1609_v8 = vpop.f32.mrb[26].mxu0 }
 0x97e   : > { %v2476_v9 = vpop.f32.mrb[27].mxu0  ;;  %v1664_v10 = vsel %vm783_vm2, %v1607_v6, -inf }
 0x97f   : > { %1665 = vmax.xlane.f32.xlu0 %v1664_v10  ;;  %v1652_v3 = vpop.f32.mrb[32].mxu1 }
 0x980   : > { %v1653_v11 = vadd.f32 %v2295_v54, %v1652_v3  ;;  %v2481_v14 = vpop.f32.mrb[33].mxu1 }
 0x981   : > { %v1655_v15 = vpop.f32.mrb[34].mxu1 }
 0x982   : > { %v2482_v17 = vpop.f32.mrb[35].mxu1  ;;  %v1667_v18 = vsel %vm783_vm2, %v1653_v11, -inf }
 0x983   : > { %1668 = vmax.xlane.f32.xlu0 %v1667_v18 }
 0x98c   : > { %1706 = vrot.lane.b32.xlu1 %v2915_v35, %s3113_s25 }
 0x996   : > { %v1660_v19 = vpop.xlane.xlu0 %1659 }
 0x997   : > { %v1670_v20 = vsub.f32 %v1515_v56, %v1660_v19 }
 0x999   : > { %v1674_v21 = vmul.f32 1.442695, %v1670_v20 }
 0x99b   : > { %2586 = vpow2.f32 %v1674_v21 }
 0x9a5   : > { %v2587_v22 = vpop.eup %2586 }
 0x9a6   : > { %v1682_v23 = vsel %vm783_vm2, %v2587_v22, 0.0 }
 0x9b0   : > { %1683 = vadd.xlane.f32.xlu1 %v1682_v23 }
 0xa08   : > { %v1663_v24 = vpop.xlane.xlu1 %1662 }
 0xa09   : > { %v1671_v16 = vsub.f32 %v1561_v62, %v1663_v24 }
 0xa0b   : > { %v1676_v25 = vmul.f32 1.442695, %v1671_v16 }
 0xa0c   : > { %v1666_v12 = vpop.xlane.xlu0 %1665  ;;  %v1707_v13 = vpop.permute.xlu1 %1706 }
 0xa0d   : > { %2588 = vpow2.f32 %v1676_v25  ;;  %v1672_v26 = vsub.f32 %v1607_v6, %v1666_v12  ;;  %v1712_v27 = vsel %vm1027_vm4, %v1707_v13, 0  ;;  %v2304_v25 = vld [vmem:[%s3081_s12] ss:$0 sm:$0xff] }
 0xa0e   : > { %2484 = vmatpush3.bf16.msra.mxu0 %v1712_v27 }
 0xa0f   : > { %v1678_v29 = vmul.f32 1.442695, %v1672_v26  ;;  %2495 = vmatprep.subr.bf16.mxu0 %v2614_v1 }
 0xa10   : > { %v1669_v30 = vpop.xlane.xlu0 %1668 }
 0xa11   : > { %2590 = vpow2.f32 %v1678_v29  ;;  %v1673_v31 = vsub.f32 %v1653_v11, %v1669_v30 }
 0xa13   : > { %v1680_v32 = vmul.f32 1.442695, %v1673_v31 }
 0xa15   : > { %2592 = vpow2.f32 %v1680_v32 }
 0xa17   : > { %v2589_v33 = vpop.eup %2588 }
 0xa18   : > { %v1685_v34 = vsel %vm783_vm2, %v2589_v33, 0.0 }
 0xa19   : > { %1686 = vadd.xlane.f32.xlu0 %v1685_v34 }
 0xa1b   : > { %v2591_v35 = vpop.eup %2590 }
 0xa1c   : > { %v1688_v36 = vsel %vm783_vm2, %v2591_v35, 0.0 }
 0xa1d   : > { %1689 = vadd.xlane.f32.xlu1 %v1688_v36 }
 0xa1f   : > { %v2593_v37 = vpop.eup %2592 }
 0xa20   : > { %v1691_v38 = vsel %vm783_vm2, %v2593_v37, 0.0 }
 0xa21   : > { %1692 = vadd.xlane.f32.xlu0 %v1691_v38  ;;  %v2563_v38 = vld [vmem:[%s3084_s15 + $0x8] sm:$0xff]  }
 0xa2e   : > { %1802 = vrot.lane.b32.xlu1 %v2932_v45, %s3113_s25 }
 0xa32   : > { %1850 = vrot.lane.b32.xlu1 %v2942_v49, %s3113_s25 }
 0xa37   : > { %1754 = vrot.lane.b32.xlu0 %v2934_v46, %s3113_s25 }
 0xa3d   : > { %v1684_v39 = vpop.xlane.xlu1 %1683 }
 0xa3e   : > { %2594 = vrcp.f32 %v1684_v39  ;;  %v2565_v39 = vld [vmem:[%s3086_s17 + $0x8] sm:$0xff]  }
 0xa48   : > { %v2595_v40 = vpop.eup %2594 }
 0xa49   : > { %v1698_v41 = vmul.f32 %v2595_v40, %v2587_v22 }
 0xa4b   : > { %v1702_v42 = vpack.c.bf16 %v1698_v41, %v1698_v41 }
 0xa4d   : > { %2486 = vmatmul.mubr.msk.bf16.vlgmr.msra.gmra.mrb[28].mxu0 %vm783_vm2, %v1702_v42 }
 0xa4e   : > { %2497 = vmatprep.mubr.msk.bf16.mxu0 %vm2615_vm0, %v2614_v1 }
 0xaa6   : > { %v1687_v43 = vpop.xlane.xlu0 %1686 }
 0xaa7   : > { %2596 = vrcp.f32 %v1687_v43 }
 0xaaa   : > { %v1690_v44 = vpop.xlane.xlu1 %1689 }
 0xaab   : > { %2598 = vrcp.f32 %v1690_v44  ;;  %v2308_v44 = vld [vmem:[%s3082_s13] ss:$0 sm:$0xff] }
 0xaae   : > { %v1803_v45 = vpop.permute.xlu1 %1802  ;;  %v1693_v47 = vpop.xlane.xlu0 %1692 }
 0xaaf   : > { %v1808_v48 = vsel %vm1027_vm4, %v1803_v45, 0  ;;  %2600 = vrcp.f32 %v1693_v47  ;;  %v2309_v47 = vld [vmem:[%s3083_s14] ss:$0 sm:$0xff] }
 0xab0   : > { %2496 = vmatpush3.bf16.msra.mxu0 %v1808_v48 }
 0xab1   : > { %v2597_v46 = vpop.eup %2596  ;;  %2507 = vmatprep.subr.bf16.mxu0 %v2614_v1 }
 0xab2   : > { %v1699_v49 = vmul.f32 %v2597_v46, %v2589_v33  ;;  %v1755_v50 = vpop.permute.xlu0 %1754  ;;  %v1851_v52 = vpop.permute.xlu1 %1850 }
 0xab3   : > { %v1760_v51 = vsel %vm1027_vm4, %v1755_v50, 0  ;;  %v1856_v56 = vsel %vm1027_vm4, %v1851_v52, 0  ;;  %v2566_v50 = vld [vmem:[%s3086_s17 + $0x10] sm:$0xff]   ;;  %v2310_v52 = vld [vmem:[%s3085_s16] ss:$0 sm:$0xff] }
 0xab4   : > { %2490 = vmatpush3.bf16.msra.mxu1 %v1760_v51  ;;  %v1703_v53 = vpack.c.bf16 %v1699_v49, %v1699_v49  ;;  %v2567_v51 = vld [vmem:[%s3086_s17 + $0x18] sm:$0xff]  }
 0xab5   : > { %v2599_v54 = vpop.eup %2598  ;;  %2501 = vmatprep.subr.bf16.mxu1 %v2614_v1 }
 0xab6   : > { %v1700_v55 = vmul.f32 %v2599_v54, %v2591_v35 }
 0xab7   : > { %2492 = vmatmul.mubr.msk.bf16.vlgmr.msra.gmra.mrb[36].mxu1 %vm783_vm2, %v1703_v53 }
 0xab8   : > { %2502 = vmatpush3.bf16.msra.mxu1 %v1856_v56  ;;  %v1704_v57 = vpack.c.bf16 %v1700_v55, %v1700_v55  ;;  %2503 = vmatprep.mubr.msk.bf16.mxu1 %vm2615_vm0, %v2614_v1 }
 0xab9   : > { %v2601_v58 = vpop.eup %2600  ;;  %2515 = vmatprep.subr.bf16.mxu1 %v2614_v1 }
 0xaba   : > { %v1701_v59 = vmul.f32 %v2601_v58, %v2593_v37  ;;  %2498 = vmatmul.mubr.msk.bf16.vlgmr.msra.gmra.mrb[32].mxu0 %vm783_vm2, %v1704_v57  ;;  %v2562_v37 = vld [vmem:[%s3084_s15] sm:$0xff]  }
 0xabb   : > { %2511 = vmatprep.mubr.msk.bf16.mxu0 %vm2615_vm0, %v2614_v1  ;;  %2508 = vmatpush3.bf16.msra.mxu0 %v2560_v2 }
 0xabc   : > { %v1705_v60 = vpack.c.bf16 %v1701_v59, %v1701_v59  ;;  %2509 = vmatprep.subr.bf16.mxu0 %v2614_v1 }
 0xabf   : > { %2504 = vmatmul.mubr.msk.bf16.vlgmr.msra.gmra.mrb[40].mxu1 %vm783_vm2, %v1705_v60  ;;  %2510 = vmatpush3.bf16.msra.mxu0 %v2561_v4 }
 0xac0   : > { %2519 = vmatprep.mubr.msk.bf16.mxu1 %vm2615_vm0, %v2614_v1  ;;  %2523 = vmatprep.subr.bf16.mxu0 %v2614_v1 }
 0xac1   : > { %2516 = vmatpush3.bf16.msra.mxu1 %v2562_v37 }
 0xac2   : > { %2517 = vmatprep.subr.bf16.mxu1 %v2614_v1 }
 0xac5   : > { %2518 = vmatpush3.bf16.msra.mxu1 %v2563_v38 }
 0xb20   : > { %v1748_v61 = vpop.f32.mrb[28].mxu0 }
 0xb21   : > { %v2487_v62 = vpop.f32.mrb[29].mxu0 }
 0xb22   : > { %v1751_v63 = vpop.f32.mrb[30].mxu0 }
 0xb23   : > { %v2488_v0 = vpop.f32.mrb[31].mxu0 }
 0xb8a   : > { %v1796_v5 = vpop.f32.mrb[36].mxu1 }
 0xb8b   : > { %1899 = vrot.lane.b32.xlu0 %v1796_v5, %s3114_s1  ;;  %v2493_v6 = vpop.f32.mrb[37].mxu1 }
 0xb8c   : > { %v1799_v7 = vpop.f32.mrb[38].mxu1 }
 0xb8d   : > { %v2494_v8 = vpop.f32.mrb[39].mxu1  ;;  %v1844_v9 = vpop.f32.mrb[32].mxu0 }
 0xb8e   : > { %1903 = vrot.lane.b32.xlu1 %v1844_v9, %s3115_s26  ;;  %v2499_v10 = vpop.f32.mrb[33].mxu0 }
 0xb8f   : > { %v1847_v3 = vpop.f32.mrb[34].mxu0 }
 0xb90   : > { %v2500_v11 = vpop.f32.mrb[35].mxu0 }
 0xb92   : > { %v1892_v14 = vpop.f32.mrb[40].mxu1 }
 0xb93   : > { %1907 = vrot.lane.b32.xlu0 %v1892_v14, %s3116_s27  ;;  %v2505_v15 = vpop.f32.mrb[41].mxu1 }
 0xb94   : > { %v1895_v17 = vpop.f32.mrb[42].mxu1  ;;  %v2320_v15 = vld [vmem:[%s3088_s19] ss:$0 sm:$0xff] }
 0xb95   : > { %v2506_v18 = vpop.f32.mrb[43].mxu1 }
 0xb96   : > { %v2321_v18 = vld [vmem:[%s3089_s20] ss:$0 sm:$0xff] }
 0xbfd   : > { %v1900_v19 = vpop.permute.xlu0 %1899 }
 0xbfe   : > { %v1910_v21 = vsel %vm783_vm2, %v1748_v61, %v1900_v19 }
 0xc00   : > { %v1904_v20 = vpop.permute.xlu1 %1903 }
 0xc01   : > { %v1911_v22 = vsel %vm1228_vm5, %v1910_v21, %v1904_v20 }
 0xc05   : > { %v1908_v23 = vpop.permute.xlu0 %1907 }
 0xc06   : > { %v1912_v24 = vsel %vm1230_vm6, %v1911_v22, %v1908_v23 }
 0xc07   : > { %v1913_v16 = vpack.c.bf16 %v1912_v24, %v1912_v24 }
 0xc09   : > { %2512 = vmatmul.mubr.msk.bf16.vlgmr.msra.gmra.mrb[36].mxu0 %vm715_vm1, %v1913_v16 }
 0xc0a   : > { %2531 = vmatprep.mubr.msk.bf16.mxu0 %vm2615_vm0, %v2614_v1 }
 0xcdc   : > { %v1969_v12 = vpop.f32.mrb[36].mxu0 }
 0xcdd   : > { %v1970_v13 = vadd.f32 %v2304_v25, %v1969_v12  ;;  %v2513_v26 = vpop.f32.mrb[37].mxu0 }
 0xcde   : > { %v1972_v27 = vpop.f32.mrb[38].mxu0 }
 0xcdf   : > { %v2514_v29 = vpop.f32.mrb[39].mxu0  ;;  %v1975_v30 = vadd.f32 %v1970_v13, %v2908_v28  ;;  %v2564_v28 = vld [vmem:[%s3086_s17] sm:$0xff]  }
 0xce0   : > { %2524 = vmatpush3.bf16.msra.mxu0 %v2564_v28 }
 0xce1   : > { %v1978_v31 = vsel %vm715_vm1, %v1975_v30, 0.0  ;;  %2525 = vmatprep.subr.bf16.mxu0 %v2614_v1 }
 0xce2   : > { %1979 = vadd.xlane.f32.xlu1 %v1978_v31 }
 0xce4   : > { %2526 = vmatpush3.bf16.msra.mxu0 %v2565_v39 }
 0xce5   : > { %2527 = vmatprep.subr.bf16.mxu0 %v2614_v1 }
 0xce8   : > { %2528 = vmatpush3.bf16.msra.mxu0 %v2566_v50 }
 0xce9   : > { %2529 = vmatprep.subr.bf16.mxu0 %v2614_v1  ;;  %v2314_v1 = vld [vmem:[%s3087_s18] ss:$0 sm:$0xff] }
 0xcec   : > { %2530 = vmatpush3.bf16.msra.mxu0 %v2567_v51 }
 0xd6f   : > { %v1980_v32 = vpop.xlane.xlu1 %1979 }
 0xd70   : > { %v1981_v33 = vmul.f32 0.03125, %v1980_v32 }
 0xd72   : > { %v1982_v34 = vsub.f32 %v1975_v30, %v1981_v33 }
 0xd74   : > { %v1983_v35 = vmul.f32 %v1982_v34, %v1982_v34 }
 0xd76   : > { %v1984_v36 = vsel %vm715_vm1, %v1983_v35, 0.0 }
 0xd77   : > { %1985 = vadd.xlane.f32.xlu0 %v1984_v36 }
 0xe04   : > { %v1986_v40 = vpop.xlane.xlu0 %1985 }
 0xe05   : > { %v1987_v41 = vmul.f32 0.03125, %v1986_v40 }
 0xe07   : > { %v1988_v42 = vadd.f32 1e-05, %v1987_v41 }
 0xe09   : > { %2602 = vrsqrt.f32 %v1988_v42 }
 0xe13   : > { %v2603_v43 = vpop.eup %2602 }
 0xe14   : > { %v1990_v45 = vmul.f32 %v2603_v43, %v1982_v34 }
 0xe16   : > { %v1997_v48 = vmul.f32 %v2308_v44, %v1990_v45 }
 0xe18   : > { %v2004_v46 = vadd.f32 %v2309_v47, %v1997_v48 }
 0xe1a   : > { %v2005_v49 = vpack.c.bf16 %v2004_v46, %v2004_v46 }
 0xe1c   : > { %2520 = vmatmul.mubr.msk.bf16.vlgmr.msra.gmra.mrb[44].mxu1 %vm715_vm1, %v2005_v49 }
 0xeef   : > { %v2066_v53 = vpop.f32.mrb[44].mxu1 }
 0xef0   : > { %v2067_v54 = vadd.f32 %v2310_v52, %v2066_v53  ;;  %v2521_v55 = vpop.f32.mrb[45].mxu1 }
 0xef1   : > { %v2069_v56 = vpop.f32.mrb[46].mxu1 }
 0xef2   : > { %v2072_v57 = vmax.f32 %v2067_v54, 0.0  ;;  %v2522_v58 = vpop.f32.mrb[47].mxu1 }
 0xef4   : > { %v2073_v59 = vpack.c.bf16 %v2072_v57, %v2072_v57 }
 0xef6   : > { %2532 = vmatmul.mubr.msk.bf16.vlgmr.msra.gmra.mrb[40].mxu0 %vm2113_vm7, %v2073_v59 }
 0xfc9   : > { %v2151_v60 = vpop.f32.mrb[40].mxu0 }
 0xfca   : > { %v2152_v61 = vadd.f32 %v2314_v1, %v2151_v60  ;;  %v2533_v62 = vpop.f32.mrb[41].mxu0 }
 0xfcb   : > { %v2154_v63 = vpop.f32.mrb[42].mxu0 }
 0xfcc   : > { %v2534_v0 = vpop.f32.mrb[43].mxu0  ;;  %v2157_v2 = vadd.f32 %v2152_v61, %v2004_v46 }
 0xfce   : > { %v2160_v4 = vsel %vm715_vm1, %v2157_v2, 0.0 }
 0xfcf   : > { %2161 = vadd.xlane.f32.xlu0 %v2160_v4 }
0x105c   : > { %v2162_v5 = vpop.xlane.xlu0 %2161 }
0x105d   : > { %v2163_v6 = vmul.f32 0.03125, %v2162_v5 }
0x105f   : > { %v2164_v7 = vsub.f32 %v2157_v2, %v2163_v6 }
0x1061   : > { %v2165_v8 = vmul.f32 %v2164_v7, %v2164_v7 }
0x1063   : > { %v2166_v9 = vsel %vm715_vm1, %v2165_v8, 0.0 }
0x1064   : > { %2167 = vadd.xlane.f32.xlu1 %v2166_v9 }
0x10f1   : > { %v2168_v10 = vpop.xlane.xlu1 %2167 }
0x10f2   : > { %v2169_v3 = vmul.f32 0.03125, %v2168_v10 }
0x10f4   : > { %v2170_v11 = vadd.f32 1e-05, %v2169_v3 }
0x10f6   : > { %2604 = vrsqrt.f32 %v2170_v11 }
0x1100   : > { %v2605_v14 = vpop.eup %2604 }
0x1101   : > { %v2172_v17 = vmul.f32 %v2605_v14, %v2164_v7 }
0x1103   : > { %v2179_v19 = vmul.f32 %v2320_v15, %v2172_v17 }
0x1105   : > { %v2186_v20 = vadd.f32 %v2321_v18, %v2179_v19 }
0x1107   : > { %v2187_v21 = vpack.c.bf16 %v2186_v20, %v2186_v20 }
0x1109   : > { %2189 = vst.msk [vmem:[%s682_s23] sm:$0xf] %vm2188_vm8, %v2187_v21 }
0x110a PF: > { %s31_s2 = sadd.s32 1, %s2612_s2  }
0x110b   : > { %p28_p4 = scmp.ge.s32.totalorder %s31_s2, 4  }
0x110d   :  { %30 = sbr.rel (!%p28_p4) target bundleno = 7 (0x7), region = 140 }

</bundles_post_ra>
